<compile_context>
chip_gen: v6e
topology: v6e:2x2x1
jax: 0.10.0
libtpu: 0.0.40
codegen_flags: <defaults>
</compile_context>

<pallas_src>
import functools

import jax
import jax.numpy as jnp
from jax import lax
from jax.experimental import pallas as pl
from jax.experimental.pallas import tpu as pltpu


# ---------------------------------------------------------------------------
# Tiling helpers (exact partitions only)
# ---------------------------------------------------------------------------

def _divisor_tile(n, cap):
    """Largest divisor of n that is <= cap (always >= 1)."""
    t = max(1, min(n, cap))
    while n % t:
        t -= 1
    return t


def _cout_tile(cout, cap=512):
    """Output-channel tile: full width if small, else a lane-aligned divisor."""
    if cout <= cap:
        return cout
    for tn in range(cap, 127, -128):          # multiples of 128 only
        if cout % tn == 0:
            return tn
    return cout


# ---------------------------------------------------------------------------
# 2x2 / stride-2 max pool
# ---------------------------------------------------------------------------

def _maxpool2x2_kernel(x_ref, o_ref):
    # x_ref: (TR, 2, Wo, 2*C)  -- (row-tile, row-of-pair, out-col, col-of-pair x C)
    # o_ref: (TR, Wo, C)
    C = o_ref.shape[-1]
    rows = jnp.maximum(x_ref[:, 0], x_ref[:, 1])             # max over the 2 rows
    o_ref[...] = jnp.maximum(rows[..., :C], rows[..., C:])   # max over the 2 cols


def maxpool2x2(x):
    """2x2 / stride-2 max pool.  x: (N, H, W, C) with even H, W."""
    N, H, W, C = x.shape
    assert H % 2 == 0 and W % 2 == 0, "MaxPool2d(2,2) needs even H and W"
    Ho, Wo = H // 2, W // 2
    R = N * Ho
    # Free, layout-preserving reshape: (N,H,W,C) -> (N*Ho, 2, Wo, 2*C); the
    # size-2 axis is the window-row member, the last-dim split is the
    # window-column member x channel.  No host transpose needed.
    xr = x.reshape(R, 2, Wo, 2 * C)
    TR = _divisor_tile(R, max(1, min(256, R // 2)))   # >=2 grid steps when R > 1
    out = pl.pallas_call(
        _maxpool2x2_kernel,
        out_shape=jax.ShapeDtypeStruct((R, Wo, C), x.dtype),
        grid=(R // TR,),
        in_specs=[pl.BlockSpec((TR, 2, Wo, 2 * C), lambda i: (i, 0, 0, 0))],
        out_specs=pl.BlockSpec((TR, Wo, C), lambda i: (i, 0, 0)),
        compiler_params=pltpu.CompilerParams(dimension_semantics=("parallel",)),
    )(xr)
    return out.reshape(N, Ho, Wo, C)


# ---------------------------------------------------------------------------
# 3x3 'same' convolution + bias + ReLU (bf16 MXU, f32 accumulation)
# ---------------------------------------------------------------------------

def _conv3x3_relu_kernel(x_ref, w_ref, b_ref, o_ref, *, H, W):
    # x_ref: ((H+3)*(W+2), Cin) bf16 -- padded image, rows flattened row-major
    # w_ref: (9, Cin, TN)      bf16 -- one (Cin, TN) matrix per 3x3 tap
    # b_ref: (1, TN)           f32
    # o_ref: (H*(W+2), TN)          -- padded-width output (junk cols dropped on host)
    Wp = W + 2
    Lp = H * Wp
    acc = jnp.zeros((Lp, o_ref.shape[-1]), jnp.float32)
    for dy in range(3):
        for dx in range(3):
            off = dy * Wp + dx                    # static sublane offset of this tap
            tap = x_ref[off:off + Lp, :]          # shifted in-VMEM view, no HBM copy
            acc = acc + jnp.dot(tap, w_ref[dy * 3 + dx],
                                preferred_element_type=jnp.float32)
    out = jnp.maximum(acc + b_ref[...], 0.0)      # bias + ReLU on the f32 accumulator
    o_ref[...] = out.astype(o_ref.dtype)


def conv3x3_same_relu(x, w, b, *, out_dtype=jnp.bfloat16):
    """3x3 'same' conv + bias + ReLU.
    x: (N,H,W,Cin), w: (9,Cin,Cout) bf16, b: (1,Cout) f32 -> (N,H,W,Cout)."""
    N, H, W, Cin = x.shape
    Cout = w.shape[-1]
    TN = _cout_tile(Cout)
    Wp = W + 2
    Lp = H * Wp
    # Single zero-pad pass: 1 halo row on top, 2 rows at the bottom (the second
    # row is slack so every tap slice of length Lp stays in bounds), 1 col L/R.
    xp = jnp.pad(x.astype(jnp.bfloat16), ((0, 0), (1, 2), (1, 1), (0, 0)))
    xflat = xp.reshape(N, (H + 3) * Wp, Cin)      # free reshape (contiguous)

    out = pl.pallas_call(
        functools.partial(_conv3x3_relu_kernel, H=H, W=W),
        out_shape=jax.ShapeDtypeStruct((N, Lp, Cout), out_dtype),
        grid=(N, Cout // TN),
        in_specs=[
            # whole padded image resident in VMEM for the grid step
            pl.BlockSpec((pl.Squeezed(), (H + 3) * Wp, Cin),
                         lambda n, j: (n, 0, 0)),
            # weights / bias resident (block index constant over the batch axis)
            pl.BlockSpec((9, Cin, TN), lambda n, j: (0, 0, j)),
            pl.BlockSpec((1, TN), lambda n, j: (0, j)),
        ],
        out_specs=pl.BlockSpec((pl.Squeezed(), Lp, TN), lambda n, j: (n, 0, j)),
        compiler_params=pltpu.CompilerParams(
            dimension_semantics=("parallel", "parallel")),
    )(xflat, w.astype(jnp.bfloat16), b)
    # Drop the two junk columns introduced by flattening the width halo.
    return out.reshape(N, H, Wp, Cout)[:, :, :W, :]


# ---------------------------------------------------------------------------
# EncoderBlock forward (NCHW in / NCHW out, like the PyTorch module)
# ---------------------------------------------------------------------------

def double_conv(p, x):
    x = conv3x3_same_relu(x, p["c1"]["w"], p["c1"]["b"], out_dtype=jnp.bfloat16)
    return conv3x3_same_relu(x, p["c2"]["w"], p["c2"]["b"], out_dtype=jnp.float32)


def encoder_block_forward(params, x_nchw):
    """EncoderBlock: MaxPool2d(2,2) -> DoubleConvolutionBlock."""
    x = jnp.transpose(x_nchw, (0, 2, 3, 1)).astype(jnp.bfloat16)   # NCHW->NHWC
    x = maxpool2x2(x)
    x = double_conv(params, x)
    return jnp.transpose(x, (0, 3, 1, 2))                          # NHWC->NCHW


def init_encoder_block(key, in_channels, out_channels):
    def conv_init(k, cin, cout):
        kw, kb = jax.random.split(k)
        std = (2.0 / (9 * cin)) ** 0.5
        w = jax.random.normal(kw, (3, 3, cin, cout), jnp.float32) * std
        b = jax.random.uniform(kb, (1, cout), jnp.float32, -0.05, 0.05)
        return {"w": w.reshape(9, cin, cout).astype(jnp.bfloat16), "b": b}
    k1, k2 = jax.random.split(key)
    return {"c1": conv_init(k1, in_channels, out_channels),
            "c2": conv_init(k2, out_channels, out_channels)}


# ---------------------------------------------------------------------------
# Pure-XLA reference (same bf16 quantization points) for a correctness check
# ---------------------------------------------------------------------------

def _reference_forward(params, x_nchw):
    x = jnp.transpose(x_nchw, (0, 2, 3, 1)).astype(jnp.bfloat16).astype(jnp.float32)
    x = lax.reduce_window(x, -jnp.inf, lax.max, (1, 2, 2, 1), (1, 2, 2, 1), "VALID")

    def conv(x, w, b):
        w = w.astype(jnp.float32).reshape(3, 3, w.shape[1], w.shape[2])
        y = lax.conv_general_dilated(
            x, w, window_strides=(1, 1), padding="SAME",
            dimension_numbers=("NHWC", "HWIO", "NHWC"),
            precision=lax.Precision.HIGHEST)
        return jnp.maximum(y + b.reshape(1, 1, 1, -1), 0.0)

    x = conv(x, params["c1"]["w"], params["c1"]["b"])
    x = x.astype(jnp.bfloat16).astype(jnp.float32)     # match inter-layer bf16
    x = conv(x, params["c2"]["w"], params["c2"]["b"])
    return jnp.transpose(x, (0, 3, 1, 2))


# ---------------------------------------------------------------------------

if __name__ == "__main__":
    in_channels, out_channels = 4, 8
    kx, kp = jax.random.split(jax.random.PRNGKey(0))
    x = jax.random.normal(kx, (2, in_channels, 16, 16), jnp.float32)
    params = init_encoder_block(kp, in_channels, out_channels)

    fwd = jax.jit(encoder_block_forward)
    out = jax.block_until_ready(fwd(params, x))

    assert out.shape == (2, out_channels, 8, 8), out.shape
    assert bool(jnp.all(jnp.isfinite(out)))

    ref = _reference_forward(params, x)
    err = float(jnp.max(jnp.abs(out - ref)))
    assert err < 3e-2, f"max abs error vs reference: {err}"

    print("KERNEL_OK")
</pallas_src>

<mosaic_0001>
module attributes {stable_mosaic.version = 11 : i64} {
  func.func @_maxpool2x2_kernel(%arg0: i32, %arg1: memref<8x2x8x8xbf16, #tpu.memory_space<vmem>>, %arg2: memref<8x8x4xbf16, #tpu.memory_space<vmem>>) attributes {dimension_semantics = [#tpu.dimension_semantics<parallel>], iteration_bounds = array<i64: 2>, scalar_prefetch = 0 : i64, scratch_operands = 0 : i64, tpu.core_type = #tpu.core_type<tc>, window_params = [{transform_indices = @transform_0, window_bounds = array<i64: 8, 2, 8, 8>}, {transform_indices = @transform_1, window_bounds = array<i64: 8, 8, 4>}]} {
    %c0 = arith.constant 0 : index
    %c0_0 = arith.constant 0 : index
    %c0_1 = arith.constant 0 : index
    %c0_2 = arith.constant 0 : index
    %0 = vector.load %arg1[%c0, %c0_0, %c0_1, %c0_2] : memref<8x2x8x8xbf16, #tpu.memory_space<vmem>>, vector<8x1x8x8xbf16>
    %1 = vector.shape_cast %0 : vector<8x1x8x8xbf16> to vector<8x8x8xbf16>
    %c0_3 = arith.constant 0 : index
    %c1 = arith.constant 1 : index
    %c0_4 = arith.constant 0 : index
    %c0_5 = arith.constant 0 : index
    %2 = vector.load %arg1[%c0_3, %c1, %c0_4, %c0_5] : memref<8x2x8x8xbf16, #tpu.memory_space<vmem>>, vector<8x1x8x8xbf16>
    %3 = vector.shape_cast %2 : vector<8x1x8x8xbf16> to vector<8x8x8xbf16>
    %4 = arith.maximumf %1, %3 : vector<8x8x8xbf16>
    %5 = vector.extract_strided_slice %4 {offsets = [0, 0, 0], sizes = [8, 8, 4], strides = [1, 1, 1]} : vector<8x8x8xbf16> to vector<8x8x4xbf16>
    %6 = vector.extract_strided_slice %4 {offsets = [0, 0, 4], sizes = [8, 8, 4], strides = [1, 1, 1]} : vector<8x8x8xbf16> to vector<8x8x4xbf16>
    %7 = arith.maximumf %5, %6 : vector<8x8x4xbf16>
    %c0_6 = arith.constant 0 : index
    %c0_7 = arith.constant 0 : index
    %c0_8 = arith.constant 0 : index
    %8 = vector.load %arg2[%c0_6, %c0_7, %c0_8] : memref<8x8x4xbf16, #tpu.memory_space<vmem>>, vector<8x8x4xbf16>
    tpu.vector_store %arg2[%c0_6, %c0_7, %c0_8], %7 {strides = array<i32>} : memref<8x8x4xbf16, #tpu.memory_space<vmem>>, vector<8x8x4xbf16>,
    return
  }
  func.func @transform_0(%arg0: i32) -> (i32, i32, i32, i32) {
    %c0_i32 = arith.constant 0 : i32
    %c0_i32_0 = arith.constant 0 : i32
    %c0_i32_1 = arith.constant 0 : i32
    %c0_i32_2 = arith.constant 0 : i32
    return %arg0, %c0_i32, %c0_i32_0, %c0_i32_1 : i32, i32, i32, i32
  }
  func.func @transform_1(%arg0: i32) -> (i32, i32, i32) {
    %c0_i32 = arith.constant 0 : i32
    %c0_i32_0 = arith.constant 0 : i32
    %c0_i32_1 = arith.constant 0 : i32
    return %arg0, %c0_i32, %c0_i32_0 : i32, i32, i32
  }
}

module attributes {stable_mosaic.version = 11 : i64} {
  func.func @_conv3x3_relu_kernel(%arg0: i32, %arg1: i32, %arg2: memref<1x110x4xbf16, #tpu.memory_space<vmem>>, %arg3: memref<9x4x8xbf16, #tpu.memory_space<vmem>>, %arg4: memref<1x8xf32, #tpu.memory_space<vmem>>, %arg5: memref<1x80x8xbf16, #tpu.memory_space<vmem>>) attributes {dimension_semantics = [#tpu.dimension_semantics<parallel>, #tpu.dimension_semantics<parallel>], iteration_bounds = array<i64: 2, 1>, scalar_prefetch = 0 : i64, scratch_operands = 0 : i64, tpu.core_type = #tpu.core_type<tc>, window_params = [{transform_indices = @transform_0, window_bounds = array<i64: 1, 110, 4>}, {transform_indices = @transform_1, window_bounds = array<i64: 9, 4, 8>}, {transform_indices = @transform_2, window_bounds = array<i64: 1, 8>}, {transform_indices = @transform_3, window_bounds = array<i64: 1, 80, 8>}]} {
    %cst = arith.constant 0.000000e+00 : f32
    %0 = vector.broadcast %cst : f32 to vector<80x8xf32>
    %c0 = arith.constant 0 : index
    %c0_0 = arith.constant 0 : index
    %c0_1 = arith.constant 0 : index
    %1 = vector.load %arg2[%c0, %c0_0, %c0_1] : memref<1x110x4xbf16, #tpu.memory_space<vmem>>, vector<1x80x4xbf16>
    %2 = vector.shape_cast %1 : vector<1x80x4xbf16> to vector<80x4xbf16>
    %c0_2 = arith.constant 0 : index
    %c0_3 = arith.constant 0 : index
    %c0_4 = arith.constant 0 : index
    %3 = vector.load %arg3[%c0_2, %c0_3, %c0_4] : memref<9x4x8xbf16, #tpu.memory_space<vmem>>, vector<1x4x8xbf16>
    %4 = vector.shape_cast %3 : vector<1x4x8xbf16> to vector<4x8xbf16>
    %cst_5 = arith.constant dense<0.000000e+00> : vector<80x8xf32>
    %5 = tpu.matmul %2, %4, %cst_5 {dimension_numbers = #tpu.dot_dimension_numbers<[1], [0], [0], [1], [0, 0, 1, 1], [], []>} : vector<80x4xbf16>, vector<4x8xbf16>, vector<80x8xf32> -> vector<80x8xf32>
    %6 = arith.addf %0, %5 : vector<80x8xf32>
    %c0_6 = arith.constant 0 : index
    %c1 = arith.constant 1 : index
    %c0_7 = arith.constant 0 : index
    %7 = vector.load %arg2[%c0_6, %c1, %c0_7] : memref<1x110x4xbf16, #tpu.memory_space<vmem>>, vector<1x80x4xbf16>
    %8 = vector.shape_cast %7 : vector<1x80x4xbf16> to vector<80x4xbf16>
    %c1_8 = arith.constant 1 : index
    %c0_9 = arith.constant 0 : index
    %c0_10 = arith.constant 0 : index
    %9 = vector.load %arg3[%c1_8, %c0_9, %c0_10] : memref<9x4x8xbf16, #tpu.memory_space<vmem>>, vector<1x4x8xbf16>
    %10 = vector.shape_cast %9 : vector<1x4x8xbf16> to vector<4x8xbf16>
    %cst_11 = arith.constant dense<0.000000e+00> : vector<80x8xf32>
    %11 = tpu.matmul %8, %10, %cst_11 {dimension_numbers = #tpu.dot_dimension_numbers<[1], [0], [0], [1], [0, 0, 1, 1], [], []>} : vector<80x4xbf16>, vector<4x8xbf16>, vector<80x8xf32> -> vector<80x8xf32>
    %12 = arith.addf %6, %11 : vector<80x8xf32>
    %c0_12 = arith.constant 0 : index
    %c2 = arith.constant 2 : index
    %c0_13 = arith.constant 0 : index
    %13 = vector.load %arg2[%c0_12, %c2, %c0_13] : memref<1x110x4xbf16, #tpu.memory_space<vmem>>, vector<1x80x4xbf16>
    %14 = vector.shape_cast %13 : vector<1x80x4xbf16> to vector<80x4xbf16>
    %c2_14 = arith.constant 2 : index
    %c0_15 = arith.constant 0 : index
    %c0_16 = arith.constant 0 : index
    %15 = vector.load %arg3[%c2_14, %c0_15, %c0_16] : memref<9x4x8xbf16, #tpu.memory_space<vmem>>, vector<1x4x8xbf16>
    %16 = vector.shape_cast %15 : vector<1x4x8xbf16> to vector<4x8xbf16>
    %cst_17 = arith.constant dense<0.000000e+00> : vector<80x8xf32>
    %17 = tpu.matmul %14, %16, %cst_17 {dimension_numbers = #tpu.dot_dimension_numbers<[1], [0], [0], [1], [0, 0, 1, 1], [], []>} : vector<80x4xbf16>, vector<4x8xbf16>, vector<80x8xf32> -> vector<80x8xf32>
    %18 = arith.addf %12, %17 : vector<80x8xf32>
    %c0_18 = arith.constant 0 : index
    %c10 = arith.constant 10 : index
    %c0_19 = arith.constant 0 : index
    %19 = vector.load %arg2[%c0_18, %c10, %c0_19] : memref<1x110x4xbf16, #tpu.memory_space<vmem>>, vector<1x80x4xbf16>
    %20 = vector.shape_cast %19 : vector<1x80x4xbf16> to vector<80x4xbf16>
    %c3 = arith.constant 3 : index
    %c0_20 = arith.constant 0 : index
    %c0_21 = arith.constant 0 : index
    %21 = vector.load %arg3[%c3, %c0_20, %c0_21] : memref<9x4x8xbf16, #tpu.memory_space<vmem>>, vector<1x4x8xbf16>
    %22 = vector.shape_cast %21 : vector<1x4x8xbf16> to vector<4x8xbf16>
    %cst_22 = arith.constant dense<0.000000e+00> : vector<80x8xf32>
    %23 = tpu.matmul %20, %22, %cst_22 {dimension_numbers = #tpu.dot_dimension_numbers<[1], [0], [0], [1], [0, 0, 1, 1], [], []>} : vector<80x4xbf16>, vector<4x8xbf16>, vector<80x8xf32> -> vector<80x8xf32>
    %24 = arith.addf %18, %23 : vector<80x8xf32>
    %c0_23 = arith.constant 0 : index
    %c11 = arith.constant 11 : index
    %c0_24 = arith.constant 0 : index
    %25 = vector.load %arg2[%c0_23, %c11, %c0_24] : memref<1x110x4xbf16, #tpu.memory_space<vmem>>, vector<1x80x4xbf16>
    %26 = vector.shape_cast %25 : vector<1x80x4xbf16> to vector<80x4xbf16>
    %c4 = arith.constant 4 : index
    %c0_25 = arith.constant 0 : index
    %c0_26 = arith.constant 0 : index
    %27 = vector.load %arg3[%c4, %c0_25, %c0_26] : memref<9x4x8xbf16, #tpu.memory_space<vmem>>, vector<1x4x8xbf16>
    %28 = vector.shape_cast %27 : vector<1x4x8xbf16> to vector<4x8xbf16>
    %cst_27 = arith.constant dense<0.000000e+00> : vector<80x8xf32>
    %29 = tpu.matmul %26, %28, %cst_27 {dimension_numbers = #tpu.dot_dimension_numbers<[1], [0], [0], [1], [0, 0, 1, 1], [], []>} : vector<80x4xbf16>, vector<4x8xbf16>, vector<80x8xf32> -> vector<80x8xf32>
    %30 = arith.addf %24, %29 : vector<80x8xf32>
    %c0_28 = arith.constant 0 : index
    %c12 = arith.constant 12 : index
    %c0_29 = arith.constant 0 : index
    %31 = vector.load %arg2[%c0_28, %c12, %c0_29] : memref<1x110x4xbf16, #tpu.memory_space<vmem>>, vector<1x80x4xbf16>
    %32 = vector.shape_cast %31 : vector<1x80x4xbf16> to vector<80x4xbf16>
    %c5 = arith.constant 5 : index
    %c0_30 = arith.constant 0 : index
    %c0_31 = arith.constant 0 : index
    %33 = vector.load %arg3[%c5, %c0_30, %c0_31] : memref<9x4x8xbf16, #tpu.memory_space<vmem>>, vector<1x4x8xbf16>
    %34 = vector.shape_cast %33 : vector<1x4x8xbf16> to vector<4x8xbf16>
    %cst_32 = arith.constant dense<0.000000e+00> : vector<80x8xf32>
    %35 = tpu.matmul %32, %34, %cst_32 {dimension_numbers = #tpu.dot_dimension_numbers<[1], [0], [0], [1], [0, 0, 1, 1], [], []>} : vector<80x4xbf16>, vector<4x8xbf16>, vector<80x8xf32> -> vector<80x8xf32>
    %36 = arith.addf %30, %35 : vector<80x8xf32>
    %c0_33 = arith.constant 0 : index
    %c20 = arith.constant 20 : index
    %c0_34 = arith.constant 0 : index
    %37 = vector.load %arg2[%c0_33, %c20, %c0_34] : memref<1x110x4xbf16, #tpu.memory_space<vmem>>, vector<1x80x4xbf16>
    %38 = vector.shape_cast %37 : vector<1x80x4xbf16> to vector<80x4xbf16>
    %c6 = arith.constant 6 : index
    %c0_35 = arith.constant 0 : index
    %c0_36 = arith.constant 0 : index
    %39 = vector.load %arg3[%c6, %c0_35, %c0_36] : memref<9x4x8xbf16, #tpu.memory_space<vmem>>, vector<1x4x8xbf16>
    %40 = vector.shape_cast %39 : vector<1x4x8xbf16> to vector<4x8xbf16>
    %cst_37 = arith.constant dense<0.000000e+00> : vector<80x8xf32>
    %41 = tpu.matmul %38, %40, %cst_37 {dimension_numbers = #tpu.dot_dimension_numbers<[1], [0], [0], [1], [0, 0, 1, 1], [], []>} : vector<80x4xbf16>, vector<4x8xbf16>, vector<80x8xf32> -> vector<80x8xf32>
    %42 = arith.addf %36, %41 : vector<80x8xf32>
    %c0_38 = arith.constant 0 : index
    %c21 = arith.constant 21 : index
    %c0_39 = arith.constant 0 : index
    %43 = vector.load %arg2[%c0_38, %c21, %c0_39] : memref<1x110x4xbf16, #tpu.memory_space<vmem>>, vector<1x80x4xbf16>
    %44 = vector.shape_cast %43 : vector<1x80x4xbf16> to vector<80x4xbf16>
    %c7 = arith.constant 7 : index
    %c0_40 = arith.constant 0 : index
    %c0_41 = arith.constant 0 : index
    %45 = vector.load %arg3[%c7, %c0_40, %c0_41] : memref<9x4x8xbf16, #tpu.memory_space<vmem>>, vector<1x4x8xbf16>
    %46 = vector.shape_cast %45 : vector<1x4x8xbf16> to vector<4x8xbf16>
    %cst_42 = arith.constant dense<0.000000e+00> : vector<80x8xf32>
    %47 = tpu.matmul %44, %46, %cst_42 {dimension_numbers = #tpu.dot_dimension_numbers<[1], [0], [0], [1], [0, 0, 1, 1], [], []>} : vector<80x4xbf16>, vector<4x8xbf16>, vector<80x8xf32> -> vector<80x8xf32>
    %48 = arith.addf %42, %47 : vector<80x8xf32>
    %c0_43 = arith.constant 0 : index
    %c22 = arith.constant 22 : index
    %c0_44 = arith.constant 0 : index
    %49 = vector.load %arg2[%c0_43, %c22, %c0_44] : memref<1x110x4xbf16, #tpu.memory_space<vmem>>, vector<1x80x4xbf16>
    %50 = vector.shape_cast %49 : vector<1x80x4xbf16> to vector<80x4xbf16>
    %c8 = arith.constant 8 : index
    %c0_45 = arith.constant 0 : index
    %c0_46 = arith.constant 0 : index
    %51 = vector.load %arg3[%c8, %c0_45, %c0_46] : memref<9x4x8xbf16, #tpu.memory_space<vmem>>, vector<1x4x8xbf16>
    %52 = vector.shape_cast %51 : vector<1x4x8xbf16> to vector<4x8xbf16>
    %cst_47 = arith.constant dense<0.000000e+00> : vector<80x8xf32>
    %53 = tpu.matmul %50, %52, %cst_47 {dimension_numbers = #tpu.dot_dimension_numbers<[1], [0], [0], [1], [0, 0, 1, 1], [], []>} : vector<80x4xbf16>, vector<4x8xbf16>, vector<80x8xf32> -> vector<80x8xf32>
    %54 = arith.addf %48, %53 : vector<80x8xf32>
    %c0_48 = arith.constant 0 : index
    %c0_49 = arith.constant 0 : index
    %55 = vector.load %arg4[%c0_48, %c0_49] : memref<1x8xf32, #tpu.memory_space<vmem>>, vector<1x8xf32>
    %56 = vector.broadcast %55 : vector<1x8xf32> to vector<80x8xf32>
    %57 = arith.addf %54, %56 : vector<80x8xf32>
    %cst_50 = arith.constant 0.000000e+00 : f32
    %58 = vector.broadcast %cst_50 : f32 to vector<80x8xf32>
    %59 = arith.maximumf %57, %58 : vector<80x8xf32>
    %60 = arith.truncf %59 : vector<80x8xf32> to vector<80x8xbf16>
    %c0_51 = arith.constant 0 : index
    %c0_52 = arith.constant 0 : index
    %c0_53 = arith.constant 0 : index
    %61 = vector.load %arg5[%c0_51, %c0_52, %c0_53] : memref<1x80x8xbf16, #tpu.memory_space<vmem>>, vector<1x80x8xbf16>
    %62 = vector.shape_cast %61 : vector<1x80x8xbf16> to vector<80x8xbf16>
    %63 = vector.shape_cast %60 : vector<80x8xbf16> to vector<1x80x8xbf16>
    tpu.vector_store %arg5[%c0_51, %c0_52, %c0_53], %63 {strides = array<i32>} : memref<1x80x8xbf16, #tpu.memory_space<vmem>>, vector<1x80x8xbf16>,
    return
  }
  func.func @transform_0(%arg0: i32, %arg1: i32) -> (i32, i32, i32) {
    %c0_i32 = arith.constant 0 : i32
    %c0_i32_0 = arith.constant 0 : i32
    %c0_i32_1 = arith.constant 0 : i32
    return %arg0, %c0_i32, %c0_i32_0 : i32, i32, i32
  }
  func.func @transform_1(%arg0: i32, %arg1: i32) -> (i32, i32, i32) {
    %c0_i32 = arith.constant 0 : i32
    %c0_i32_0 = arith.constant 0 : i32
    %c0_i32_1 = arith.constant 0 : i32
    return %c0_i32, %c0_i32_0, %arg1 : i32, i32, i32
  }
  func.func @transform_2(%arg0: i32, %arg1: i32) -> (i32, i32) {
    %c0_i32 = arith.constant 0 : i32
    %c0_i32_0 = arith.constant 0 : i32
    return %c0_i32, %arg1 : i32, i32
  }
  func.func @transform_3(%arg0: i32, %arg1: i32) -> (i32, i32, i32) {
    %c0_i32 = arith.constant 0 : i32
    %c0_i32_0 = arith.constant 0 : i32
    return %arg0, %c0_i32, %arg1 : i32, i32, i32
  }
}

module attributes {stable_mosaic.version = 11 : i64} {
  func.func @_conv3x3_relu_kernel(%arg0: i32, %arg1: i32, %arg2: memref<1x110x8xbf16, #tpu.memory_space<vmem>>, %arg3: memref<9x8x8xbf16, #tpu.memory_space<vmem>>, %arg4: memref<1x8xf32, #tpu.memory_space<vmem>>, %arg5: memref<1x80x8xf32, #tpu.memory_space<vmem>>) attributes {dimension_semantics = [#tpu.dimension_semantics<parallel>, #tpu.dimension_semantics<parallel>], iteration_bounds = array<i64: 2, 1>, scalar_prefetch = 0 : i64, scratch_operands = 0 : i64, tpu.core_type = #tpu.core_type<tc>, window_params = [{transform_indices = @transform_0, window_bounds = array<i64: 1, 110, 8>}, {transform_indices = @transform_1, window_bounds = array<i64: 9, 8, 8>}, {transform_indices = @transform_2, window_bounds = array<i64: 1, 8>}, {transform_indices = @transform_3, window_bounds = array<i64: 1, 80, 8>}]} {
    %cst = arith.constant 0.000000e+00 : f32
    %0 = vector.broadcast %cst : f32 to vector<80x8xf32>
    %c0 = arith.constant 0 : index
    %c0_0 = arith.constant 0 : index
    %c0_1 = arith.constant 0 : index
    %1 = vector.load %arg2[%c0, %c0_0, %c0_1] : memref<1x110x8xbf16, #tpu.memory_space<vmem>>, vector<1x80x8xbf16>
    %2 = vector.shape_cast %1 : vector<1x80x8xbf16> to vector<80x8xbf16>
    %c0_2 = arith.constant 0 : index
    %c0_3 = arith.constant 0 : index
    %c0_4 = arith.constant 0 : index
    %3 = vector.load %arg3[%c0_2, %c0_3, %c0_4] : memref<9x8x8xbf16, #tpu.memory_space<vmem>>, vector<1x8x8xbf16>
    %4 = vector.shape_cast %3 : vector<1x8x8xbf16> to vector<8x8xbf16>
    %cst_5 = arith.constant dense<0.000000e+00> : vector<80x8xf32>
    %5 = tpu.matmul %2, %4, %cst_5 {dimension_numbers = #tpu.dot_dimension_numbers<[1], [0], [0], [1], [0, 0, 1, 1], [], []>} : vector<80x8xbf16>, vector<8x8xbf16>, vector<80x8xf32> -> vector<80x8xf32>
    %6 = arith.addf %0, %5 : vector<80x8xf32>
    %c0_6 = arith.constant 0 : index
    %c1 = arith.constant 1 : index
    %c0_7 = arith.constant 0 : index
    %7 = vector.load %arg2[%c0_6, %c1, %c0_7] : memref<1x110x8xbf16, #tpu.memory_space<vmem>>, vector<1x80x8xbf16>
    %8 = vector.shape_cast %7 : vector<1x80x8xbf16> to vector<80x8xbf16>
    %c1_8 = arith.constant 1 : index
    %c0_9 = arith.constant 0 : index
    %c0_10 = arith.constant 0 : index
    %9 = vector.load %arg3[%c1_8, %c0_9, %c0_10] : memref<9x8x8xbf16, #tpu.memory_space<vmem>>, vector<1x8x8xbf16>
    %10 = vector.shape_cast %9 : vector<1x8x8xbf16> to vector<8x8xbf16>
    %cst_11 = arith.constant dense<0.000000e+00> : vector<80x8xf32>
    %11 = tpu.matmul %8, %10, %cst_11 {dimension_numbers = #tpu.dot_dimension_numbers<[1], [0], [0], [1], [0, 0, 1, 1], [], []>} : vector<80x8xbf16>, vector<8x8xbf16>, vector<80x8xf32> -> vector<80x8xf32>
    %12 = arith.addf %6, %11 : vector<80x8xf32>
    %c0_12 = arith.constant 0 : index
    %c2 = arith.constant 2 : index
    %c0_13 = arith.constant 0 : index
    %13 = vector.load %arg2[%c0_12, %c2, %c0_13] : memref<1x110x8xbf16, #tpu.memory_space<vmem>>, vector<1x80x8xbf16>
    %14 = vector.shape_cast %13 : vector<1x80x8xbf16> to vector<80x8xbf16>
    %c2_14 = arith.constant 2 : index
    %c0_15 = arith.constant 0 : index
    %c0_16 = arith.constant 0 : index
    %15 = vector.load %arg3[%c2_14, %c0_15, %c0_16] : memref<9x8x8xbf16, #tpu.memory_space<vmem>>, vector<1x8x8xbf16>
    %16 = vector.shape_cast %15 : vector<1x8x8xbf16> to vector<8x8xbf16>
    %cst_17 = arith.constant dense<0.000000e+00> : vector<80x8xf32>
    %17 = tpu.matmul %14, %16, %cst_17 {dimension_numbers = #tpu.dot_dimension_numbers<[1], [0], [0], [1], [0, 0, 1, 1], [], []>} : vector<80x8xbf16>, vector<8x8xbf16>, vector<80x8xf32> -> vector<80x8xf32>
    %18 = arith.addf %12, %17 : vector<80x8xf32>
    %c0_18 = arith.constant 0 : index
    %c10 = arith.constant 10 : index
    %c0_19 = arith.constant 0 : index
    %19 = vector.load %arg2[%c0_18, %c10, %c0_19] : memref<1x110x8xbf16, #tpu.memory_space<vmem>>, vector<1x80x8xbf16>
    %20 = vector.shape_cast %19 : vector<1x80x8xbf16> to vector<80x8xbf16>
    %c3 = arith.constant 3 : index
    %c0_20 = arith.constant 0 : index
    %c0_21 = arith.constant 0 : index
    %21 = vector.load %arg3[%c3, %c0_20, %c0_21] : memref<9x8x8xbf16, #tpu.memory_space<vmem>>, vector<1x8x8xbf16>
    %22 = vector.shape_cast %21 : vector<1x8x8xbf16> to vector<8x8xbf16>
    %cst_22 = arith.constant dense<0.000000e+00> : vector<80x8xf32>
    %23 = tpu.matmul %20, %22, %cst_22 {dimension_numbers = #tpu.dot_dimension_numbers<[1], [0], [0], [1], [0, 0, 1, 1], [], []>} : vector<80x8xbf16>, vector<8x8xbf16>, vector<80x8xf32> -> vector<80x8xf32>
    %24 = arith.addf %18, %23 : vector<80x8xf32>
    %c0_23 = arith.constant 0 : index
    %c11 = arith.constant 11 : index
    %c0_24 = arith.constant 0 : index
    %25 = vector.load %arg2[%c0_23, %c11, %c0_24] : memref<1x110x8xbf16, #tpu.memory_space<vmem>>, vector<1x80x8xbf16>
    %26 = vector.shape_cast %25 : vector<1x80x8xbf16> to vector<80x8xbf16>
    %c4 = arith.constant 4 : index
    %c0_25 = arith.constant 0 : index
    %c0_26 = arith.constant 0 : index
    %27 = vector.load %arg3[%c4, %c0_25, %c0_26] : memref<9x8x8xbf16, #tpu.memory_space<vmem>>, vector<1x8x8xbf16>
    %28 = vector.shape_cast %27 : vector<1x8x8xbf16> to vector<8x8xbf16>
    %cst_27 = arith.constant dense<0.000000e+00> : vector<80x8xf32>
    %29 = tpu.matmul %26, %28, %cst_27 {dimension_numbers = #tpu.dot_dimension_numbers<[1], [0], [0], [1], [0, 0, 1, 1], [], []>} : vector<80x8xbf16>, vector<8x8xbf16>, vector<80x8xf32> -> vector<80x8xf32>
    %30 = arith.addf %24, %29 : vector<80x8xf32>
    %c0_28 = arith.constant 0 : index
    %c12 = arith.constant 12 : index
    %c0_29 = arith.constant 0 : index
    %31 = vector.load %arg2[%c0_28, %c12, %c0_29] : memref<1x110x8xbf16, #tpu.memory_space<vmem>>, vector<1x80x8xbf16>
    %32 = vector.shape_cast %31 : vector<1x80x8xbf16> to vector<80x8xbf16>
    %c5 = arith.constant 5 : index
    %c0_30 = arith.constant 0 : index
    %c0_31 = arith.constant 0 : index
    %33 = vector.load %arg3[%c5, %c0_30, %c0_31] : memref<9x8x8xbf16, #tpu.memory_space<vmem>>, vector<1x8x8xbf16>
    %34 = vector.shape_cast %33 : vector<1x8x8xbf16> to vector<8x8xbf16>
    %cst_32 = arith.constant dense<0.000000e+00> : vector<80x8xf32>
    %35 = tpu.matmul %32, %34, %cst_32 {dimension_numbers = #tpu.dot_dimension_numbers<[1], [0], [0], [1], [0, 0, 1, 1], [], []>} : vector<80x8xbf16>, vector<8x8xbf16>, vector<80x8xf32> -> vector<80x8xf32>
    %36 = arith.addf %30, %35 : vector<80x8xf32>
    %c0_33 = arith.constant 0 : index
    %c20 = arith.constant 20 : index
    %c0_34 = arith.constant 0 : index
    %37 = vector.load %arg2[%c0_33, %c20, %c0_34] : memref<1x110x8xbf16, #tpu.memory_space<vmem>>, vector<1x80x8xbf16>
    %38 = vector.shape_cast %37 : vector<1x80x8xbf16> to vector<80x8xbf16>
    %c6 = arith.constant 6 : index
    %c0_35 = arith.constant 0 : index
    %c0_36 = arith.constant 0 : index
    %39 = vector.load %arg3[%c6, %c0_35, %c0_36] : memref<9x8x8xbf16, #tpu.memory_space<vmem>>, vector<1x8x8xbf16>
    %40 = vector.shape_cast %39 : vector<1x8x8xbf16> to vector<8x8xbf16>
    %cst_37 = arith.constant dense<0.000000e+00> : vector<80x8xf32>
    %41 = tpu.matmul %38, %40, %cst_37 {dimension_numbers = #tpu.dot_dimension_numbers<[1], [0], [0], [1], [0, 0, 1, 1], [], []>} : vector<80x8xbf16>, vector<8x8xbf16>, vector<80x8xf32> -> vector<80x8xf32>
    %42 = arith.addf %36, %41 : vector<80x8xf32>
    %c0_38 = arith.constant 0 : index
    %c21 = arith.constant 21 : index
    %c0_39 = arith.constant 0 : index
    %43 = vector.load %arg2[%c0_38, %c21, %c0_39] : memref<1x110x8xbf16, #tpu.memory_space<vmem>>, vector<1x80x8xbf16>
    %44 = vector.shape_cast %43 : vector<1x80x8xbf16> to vector<80x8xbf16>
    %c7 = arith.constant 7 : index
    %c0_40 = arith.constant 0 : index
    %c0_41 = arith.constant 0 : index
    %45 = vector.load %arg3[%c7, %c0_40, %c0_41] : memref<9x8x8xbf16, #tpu.memory_space<vmem>>, vector<1x8x8xbf16>
    %46 = vector.shape_cast %45 : vector<1x8x8xbf16> to vector<8x8xbf16>
    %cst_42 = arith.constant dense<0.000000e+00> : vector<80x8xf32>
    %47 = tpu.matmul %44, %46, %cst_42 {dimension_numbers = #tpu.dot_dimension_numbers<[1], [0], [0], [1], [0, 0, 1, 1], [], []>} : vector<80x8xbf16>, vector<8x8xbf16>, vector<80x8xf32> -> vector<80x8xf32>
    %48 = arith.addf %42, %47 : vector<80x8xf32>
    %c0_43 = arith.constant 0 : index
    %c22 = arith.constant 22 : index
    %c0_44 = arith.constant 0 : index
    %49 = vector.load %arg2[%c0_43, %c22, %c0_44] : memref<1x110x8xbf16, #tpu.memory_space<vmem>>, vector<1x80x8xbf16>
    %50 = vector.shape_cast %49 : vector<1x80x8xbf16> to vector<80x8xbf16>
    %c8 = arith.constant 8 : index
    %c0_45 = arith.constant 0 : index
    %c0_46 = arith.constant 0 : index
    %51 = vector.load %arg3[%c8, %c0_45, %c0_46] : memref<9x8x8xbf16, #tpu.memory_space<vmem>>, vector<1x8x8xbf16>
    %52 = vector.shape_cast %51 : vector<1x8x8xbf16> to vector<8x8xbf16>
    %cst_47 = arith.constant dense<0.000000e+00> : vector<80x8xf32>
    %53 = tpu.matmul %50, %52, %cst_47 {dimension_numbers = #tpu.dot_dimension_numbers<[1], [0], [0], [1], [0, 0, 1, 1], [], []>} : vector<80x8xbf16>, vector<8x8xbf16>, vector<80x8xf32> -> vector<80x8xf32>
    %54 = arith.addf %48, %53 : vector<80x8xf32>
    %c0_48 = arith.constant 0 : index
    %c0_49 = arith.constant 0 : index
    %55 = vector.load %arg4[%c0_48, %c0_49] : memref<1x8xf32, #tpu.memory_space<vmem>>, vector<1x8xf32>
    %56 = vector.broadcast %55 : vector<1x8xf32> to vector<80x8xf32>
    %57 = arith.addf %54, %56 : vector<80x8xf32>
    %cst_50 = arith.constant 0.000000e+00 : f32
    %58 = vector.broadcast %cst_50 : f32 to vector<80x8xf32>
    %59 = arith.maximumf %57, %58 : vector<80x8xf32>
    %c0_51 = arith.constant 0 : index
    %c0_52 = arith.constant 0 : index
    %c0_53 = arith.constant 0 : index
    %60 = vector.load %arg5[%c0_51, %c0_52, %c0_53] : memref<1x80x8xf32, #tpu.memory_space<vmem>>, vector<1x80x8xf32>
    %61 = vector.shape_cast %60 : vector<1x80x8xf32> to vector<80x8xf32>
    %62 = vector.shape_cast %59 : vector<80x8xf32> to vector<1x80x8xf32>
    tpu.vector_store %arg5[%c0_51, %c0_52, %c0_53], %62 {strides = array<i32>} : memref<1x80x8xf32, #tpu.memory_space<vmem>>, vector<1x80x8xf32>,
    return
  }
  func.func @transform_0(%arg0: i32, %arg1: i32) -> (i32, i32, i32) {
    %c0_i32 = arith.constant 0 : i32
    %c0_i32_0 = arith.constant 0 : i32
    %c0_i32_1 = arith.constant 0 : i32
    return %arg0, %c0_i32, %c0_i32_0 : i32, i32, i32
  }
  func.func @transform_1(%arg0: i32, %arg1: i32) -> (i32, i32, i32) {
    %c0_i32 = arith.constant 0 : i32
    %c0_i32_0 = arith.constant 0 : i32
    %c0_i32_1 = arith.constant 0 : i32
    return %c0_i32, %c0_i32_0, %arg1 : i32, i32, i32
  }
  func.func @transform_2(%arg0: i32, %arg1: i32) -> (i32, i32) {
    %c0_i32 = arith.constant 0 : i32
    %c0_i32_0 = arith.constant 0 : i32
    return %c0_i32, %arg1 : i32, i32
  }
  func.func @transform_3(%arg0: i32, %arg1: i32) -> (i32, i32, i32) {
    %c0_i32 = arith.constant 0 : i32
    %c0_i32_0 = arith.constant 0 : i32
    return %arg0, %c0_i32, %arg1 : i32, i32, i32
  }
}

</mosaic_0001>

<bundles_post_ra>
// kernel: encoder_block_forward.3
= control target key start
LH: loop header
LB: loop body
LE: loop exit
PB: predicated region body
PF: predicated region fallthrough
CT: control target
= control target key end

     0   :  { %s302_s6 = smov 0   ;;  %s331_s0 = inlined_call_operand.vmem [shape: bf16[16,2,8,8], index: 0, kind: input, shape index: {}]   ;;  %s332_s1 = inlined_call_operand.vmem [shape: bf16[16,8,4], index: 1, kind: output, shape index: {}]  }
   0x1 LB: > { %s253_s7 = sadd.s32 4294967295, %s289_s6   ;;  %p257_p0 = scmp.ge.s32.totalorder %s289_s6, 1  ;;  %s289_s6 = sphi %s302_s6, %s11_s6  }
   0x2   : > { %p89_p1 = scmp.lt.s32.totalorder %s289_s6, 3 }
   0x4   : > { %p90_p2 = pnand %p257_p0, %p89_p1 }
   0x5   : > { %s258_s8 = sshll.u32 (!%p90_p2), %s253_s7, 3  ;;  %s291_s13 = smov (!%p90_p2), 124  }
   0x6   : > { %93 = sbr.rel (%p90_p2) target bundleno = 148 (0x94), region = 24  ;;  %p111_p3 = scmp.lt.s32.totalorder (!%p90_p2), %s258_s8, 15 }
   0xb   : > { %s334_s8 = smov (!%p111_p3, %s258_s8), 15  ;;  %vm188_vm0 = vcmask 27648  }
   0xc   : > { %s273_s9 = sshll.u32 %s334_s8, 3  ;;  %s262_s14 = sshll.u32 %s334_s8, 2 }
   0xd   : > { %s115_s12 = scalar_lea.vmem %s331_s0, %s273_s9  ;;  %s121_s17 = scalar_lea.vmem %s332_s1, %s262_s14 }
   0xe   : > { %v125_v0 = vld [vmem:[%s115_s12 + $0x10] sm:$0xf]  ;;  %v265_v1 = vld [vmem:[%s115_s12 + $0x14] sm:$0xf]  ;;  %v123_v2 = vld [vmem:[%s115_s12] sm:$0xf] }
   0xf   : > { %v142_v3 = vmax.bf16 %v265_v1, %v125_v0  ;;  %v263_v4 = vld [vmem:[%s115_s12 + $0x4] sm:$0xf]  ;;  %v126_v5 = vld [vmem:[%s115_s12 + $0x18] sm:$0xf]  ;;  %v266_v6 = vld [vmem:[%s115_s12 + $0x1c] sm:$0xf] }
  0x10   : > { %v140_v7 = vmax.bf16 %v263_v4, %v123_v2  ;;  %v124_v8 = vld [vmem:[%s115_s12 + $0x8] sm:$0xf]  ;;  %v264_v9 = vld [vmem:[%s115_s12 + $0xc] sm:$0xf]  ;;  %v143_v10 = vmax.bf16 %v266_v6, %v126_v5  ;;  %v127_v14 = vld [vmem:[%s115_s12 + $0x20] sm:$0xf] }
  0x11   : > { %160 = vrot.lane.b32.xlu1 %v142_v3, %s291_s13  ;;  %v141_v11 = vmax.bf16 %v264_v9, %v124_v8  ;;  %v128_v12 = vld [vmem:[%s115_s12 + $0x28] sm:$0xf]  ;;  %v268_v13 = vld [vmem:[%s115_s12 + $0x2c] sm:$0xf]  ;;  %v267_v15 = vld [vmem:[%s115_s12 + $0x24] sm:$0xf] }
  0x12   : > { %156 = vrot.lane.b32.xlu0 %v140_v7, %s291_s13  ;;  %v145_v16 = vmax.bf16 %v268_v13, %v128_v12  ;;  %v144_v17 = vmax.bf16 %v267_v15, %v127_v14  ;;  %v130_v18 = vld [vmem:[%s115_s12 + $0x38] sm:$0xf]  ;;  %v270_v19 = vld [vmem:[%s115_s12 + $0x3c] sm:$0xf]  ;;  %v129_v20 = vld [vmem:[%s115_s12 + $0x30] sm:$0xf] }
  0x13   : > { %v269_v21 = vld [vmem:[%s115_s12 + $0x34] sm:$0xf]  ;;  %v147_v22 = vmax.bf16 %v270_v19, %v130_v18 }
  0x14   : > { %v146_v23 = vmax.bf16 %v269_v21, %v129_v20 }
  0x15   : > { %162 = vrot.lane.b32.xlu1 %v143_v10, %s291_s13 }
  0x16   : > { %158 = vrot.lane.b32.xlu0 %v141_v11, %s291_s13 }
  0x19   : > { %166 = vrot.lane.b32.xlu1 %v145_v16, %s291_s13 }
  0x1a   : > { %164 = vrot.lane.b32.xlu0 %v144_v17, %s291_s13 }
  0x1d   : > { %170 = vrot.lane.b32.xlu1 %v147_v22, %s291_s13 }
  0x1e   : > { %168 = vrot.lane.b32.xlu0 %v146_v23, %s291_s13 }
  0x83   : > { %v161_v24 = vpop.permute.xlu1 %160 }
  0x84   : > { %v182_v25 = vmax.bf16 %v161_v24, %v142_v3  ;;  %v157_v26 = vpop.permute.xlu0 %156 }
  0x85   : > { %v180_v27 = vmax.bf16 %v157_v26, %v140_v7 }
  0x86   : > { %191 = vst.msk [vmem:[%s121_s17 + $0x8] sm:$0xf] %vm188_vm0, %v182_v25 }
  0x87   : > { %189 = vst.msk [vmem:[%s121_s17] sm:$0xf] %vm188_vm0, %v180_v27  ;;  %v163_v28 = vpop.permute.xlu1 %162 }
  0x88   : > { %v183_v29 = vmax.bf16 %v163_v28, %v143_v10  ;;  %v159_v30 = vpop.permute.xlu0 %158 }
  0x89   : > { %v181_v31 = vmax.bf16 %v159_v30, %v141_v11 }
  0x8a   : > { %192 = vst.msk [vmem:[%s121_s17 + $0xc] sm:$0xf] %vm188_vm0, %v183_v29 }
  0x8b   : > { %190 = vst.msk [vmem:[%s121_s17 + $0x4] sm:$0xf] %vm188_vm0, %v181_v31  ;;  %v167_v32 = vpop.permute.xlu1 %166 }
  0x8c   : > { %v185_v33 = vmax.bf16 %v167_v32, %v145_v16  ;;  %v165_v34 = vpop.permute.xlu0 %164 }
  0x8d   : > { %v184_v35 = vmax.bf16 %v165_v34, %v144_v17 }
  0x8e   : > { %194 = vst.msk [vmem:[%s121_s17 + $0x14] sm:$0xf] %vm188_vm0, %v185_v33 }
  0x8f   : > { %193 = vst.msk [vmem:[%s121_s17 + $0x10] sm:$0xf] %vm188_vm0, %v184_v35  ;;  %v171_v36 = vpop.permute.xlu1 %170 }
  0x90   : > { %v187_v37 = vmax.bf16 %v171_v36, %v147_v22  ;;  %v169_v38 = vpop.permute.xlu0 %168 }
  0x91   : > { %v186_v39 = vmax.bf16 %v169_v38, %v146_v23 }
  0x92   : > { %196 = vst.msk [vmem:[%s121_s17 + $0x1c] sm:$0xf] %vm188_vm0, %v187_v37 }
  0x93   : > { %195 = vst.msk [vmem:[%s121_s17 + $0x18] sm:$0xf] %vm188_vm0, %v186_v39 }
  0x94 PF: > { %s11_s6 = sadd.s32 1, %s289_s6  }
  0x95   : > { %p8_p4 = scmp.ge.s32.totalorder %s11_s6, 4  }
  0x97   :  { %10 = sbr.rel (!%p8_p4) target bundleno = 1 (0x1), region = 55 }

// kernel: encoder_block_forward.5
= control target key start
LH: loop header
LB: loop body
LE: loop exit
PB: predicated region body
PF: predicated region fallthrough
CT: control target
= control target key end

     0   :  { %s2055_s12 = smov 0   ;;  %s2057_s13 = smov 0   ;;  %s2549_s0 = inlined_call_operand.vmem [shape: bf16[2,110,8], index: 0, kind: input, shape index: {}]   ;;  %s2550_s1 = inlined_call_operand.vmem [shape: bf16[9,8,8], index: 1, kind: input, shape index: {}]   ;;  %s2551_s2 = inlined_call_operand.vmem [shape: f32[1,8], index: 2, kind: input, shape index: {}]   ;;  %s2552_s3 = inlined_call_operand.vmem [shape: f32[2,80,8], index: 3, kind: output, shape index: {}]  }
   0x1   :  { %s2059_s14 = smov 0  }
   0x2 LB: > { %s25_s15 = sadd.s32 1, %s2027_s13  ;;  %p1622_p0 = scmp.ge.s32.totalorder %s2031_s14, 1  ;;  %s2031_s14 = sphi %s2059_s14, %s13_s14   ;;  %s2027_s13 = sphi %s2057_s13, %s2554_s13   ;;  %s2023_s12 = sphi %s2055_s12, %s2553_s12  }
   0x3   : > { %p27_p1 = scmp.ge.s32.totalorder %s25_s15, 2  ;;  %p168_p2 = scmp.lt.s32.totalorder %s2031_s14, 3 }
   0x5   : > { %s2556_s15 = smov (%p27_p1, %s25_s15), 0  ;;  %p169_p3 = pnand %p1622_p0, %p168_p2 }
   0x6   : > { %p202_p4 = scmp.lt.s32.totalorder (!%p169_p3), %s2023_s12, 1 }
   0x7   : > { %172 = sbr.rel (%p169_p3) target bundleno = 406 (0x196), region = 32 }
   0xc   : > { %v1625_v0 = vld [vmem:[%s2550_s1 + $0x4] sm:$0xf]  ;;  %vm326_vm0 = vcmask 1043456   ;;  %v2033_v1 = vmov 0.0   ;;  %s2558_s12 = smov (!%p202_p4, %s2023_s12), 1  ;;  %vm2034_vm1 = vmmov 0  }
   0xd   : > { %1758 = vmatprep.subr.bf16.mxu0 %v2033_v1  ;;  %1956 = vmatprep.subr.bf16.mxu1 %v2033_v1  ;;  %v328_v2 = vsel %vm326_vm0, %v1625_v0, 0  ;;  %s1958_s18 = smul.u32 56, %s2558_s12  ;;  %vm265_vm2 = vsmask.f32 7424  ;;  %v1642_v13 = vld [vmem:[%s2550_s1 + $0x8] sm:$0xf] }
   0xe   : > { %1759 = vmatpush3.bf16.msra.mxu0 %v328_v2  ;;  %1957 = vmatpush3.bf16.msra.mxu1 %v328_v2  ;;  %vm310_vm3 = vcmask 64512   ;;  %v233_v22 = vld [vmem:[%s2550_s1] sm:$0xf]  ;;  %v523_v26 = vsel %vm326_vm0, %v1642_v13, 0  ;;  %vm495_vm4 = vcmask 1046528   ;;  %vm928_vm6 = vcmask 1045504  }
   0xf   : > { %1760 = vmatprep.mubr.msk.bf16.mxu0 %vm2034_vm1, %v2033_v1  ;;  %1772 = vmatprep.mubr.msk.bf16.mxu1 %vm2034_vm1, %v2033_v1  ;;  %s2091_s21 = scalar_lea.vmem %s2549_s0, %s1958_s18  ;;  %v414_v31 = vsel %vm326_vm0, %v233_v22, 0  ;;  %v1649_v48 = vld [vmem:[%s2550_s1 + $0xc] sm:$0xf]  ;;  %v1661_v53 = vld [vmem:[%s2550_s1 + $0x10] sm:$0xf]  ;;  %vm1361_vm8 = vcmask 1044480  }
  0x10   : > { %1802 = vmatprep.subr.bf16.mxu0 %v2033_v1  ;;  %1780 = vmatprep.subr.bf16.mxu1 %v2033_v1  ;;  %v223_v3 = vld [vmem:[%s2091_s21] sm:$0xf]  ;;  %v2095_v4 = vld [vmem:[%s2091_s21 + $0x4] sm:$0xf]  ;;  %v2101_v6 = vld [vmem:[%s2091_s21 + $0x8] sm:$0xff]   ;;  %v676_v50 = vsel %vm326_vm0, %v1649_v48, 0 }
  0x11   : > { %v2098_v5 = vcombine.low %v223_v3, %v2095_v4  ;;  %v274_v9 = vshll.u32 %v2101_v6, 16  ;;  %v2107_v10 = vld [vmem:[%s2091_s21 + $0x18] sm:$0xff]   ;;  %v2110_v11 = vld [vmem:[%s2091_s21 + $0x20] sm:$0xff]   ;;  %v2113_v12 = vld [vmem:[%s2091_s21 + $0x10] sm:$0xff]   ;;  %v278_v23 = vshrl.u32 %v2101_v6, 16  ;;  %v497_v52 = vrot.slane %v2101_v6, 1 }
  0x12   : > { %v290_v16 = vshll.u32 %v2107_v10, 16  ;;  %v294_v17 = vshrl.u32 %v2107_v10, 16  ;;  %v298_v18 = vshll.u32 %v2110_v11, 16  ;;  %v2122_v19 = vld [vmem:[%s2091_s21 + $0x28] ss:$0 sps:$4 sm:$0x11]  }
  0x13   : > { %v267_v7 = vshrl.u32 %v2098_v5, 16  ;;  %v269_v8 = vshll.u32 %v2098_v5, 16  ;;  %v276_v15 = vrot.slane %v274_v9, 1  ;;  %v282_v24 = vshll.u32 %v2113_v12, 16  ;;  %v2146_v39 = vld [vmem:[%s2091_s21 + $0x24] sm:$0xff]   ;;  %v2217_v2 = vld [vmem:[%s2091_s21 + $0xc] sm:$0xff]  }
  0x14   : > { %v292_v21 = vrot.slane %v290_v16, 1  ;;  %v300_v25 = vrot.slane %v298_v18, 1  ;;  %v302_v29 = vshrl.u32 %v2110_v11, 16  ;;  %v306_v30 = vshll.u32 %v2122_v19, 16  ;;  %v489_v43 = vld [vmem:[%s2091_s21] sm:$0xe] }
  0x15   : > { %v271_v14 = vrot.slane %v269_v8, 1  ;;  %v280_v33 = vor.u32 %v278_v23, %v276_v15  ;;  %v284_v34 = vrot.slane %v282_v24, 1  ;;  %v286_v38 = vshrl.u32 %v2113_v12, 16  ;;  %v1998_v40 = vld [vmem:[%s2091_s21 + $0x2c] ss:$0 sps:$4 sm:$0x11]  }
  0x16   : > { %v296_v28 = vor.u32 %v294_v17, %v292_v21  ;;  %v304_v35 = vor.u32 %v302_v29, %v300_v25  ;;  %v308_v36 = vrot.slane %v306_v30, 1  ;;  %v656_v44 = vrot.slane %v2146_v39, 1  ;;  %v608_v61 = vld [vmem:[%s2091_s21 + $0x4] sm:$0xe]  ;;  %v2212_v62 = vld [vmem:[%s2091_s21 + $0x8] sm:$0xf] }
  0x17   : > { %v272_v20 = vor.u32 %v271_v14, %v267_v7  ;;  %v285_v37 = vsel %vm265_vm2, %v280_v33, %v284_v34  ;;  %v288_v42 = vor.u32 %v286_v38, %v284_v34  ;;  %v658_v45 = vrot.slane %v1998_v40, 1  ;;  %v2236_v18 = vld [vmem:[%s2091_s21 + $0x14] sm:$0xff]   ;;  %v2256_v30 = vld [vmem:[%s2091_s21 + $0x1c] sm:$0xff]   ;;  %v2280_v48 = vld [vmem:[%s2091_s21 + $0x2c] ss:$0 sps:$4 sm:$0x33]  }
  0x18   : > { %v301_v32 = vsel %vm265_vm2, %v296_v28, %v300_v25  ;;  %v309_v41 = vsel %vm265_vm2, %v304_v35, %v308_v36  ;;  %v1643_v49 = vcombine.low %v489_v43, %v2095_v4  ;;  %v837_v55 = vsel %vm326_vm0, %v1661_v53, 0  ;;  %v1675_v24 = vld [vmem:[%s2550_s1 + $0x18] sm:$0xf]  ;;  %v922_v53 = vld [vmem:[%s2091_s21 + $0x4] sm:$0xc]  ;;  %s1959_s11 = smul.u32 80, %s2558_s12 }
  0x19   : > { %v277_v27 = vsel %vm265_vm2, %v272_v20, %v276_v15  ;;  %1773 = vmatmul.mubr.msk.bf16.vlgmr.msra.gmra.mxu1 %vm310_vm3, %v301_v32  ;;  %v2161_v46 = vsel %vm495_vm4, %v656_v44, %v658_v45  ;;  %v293_v47 = vsel %vm265_vm2, %v288_v42, %v292_v21  ;;  %v499_v56 = vrot.slane %v2113_v12, 1 }
  0x1a   : > { %1761 = vmatmul.mubr.msk.bf16.vlgmr.msra.gmra.mxu0 %vm310_vm3, %v277_v27  ;;  %1781 = vmatpush3.bf16.msra.mxu1 %v414_v31  ;;  %v496_v51 = vrot.slane %v1643_v49, 1  ;;  %v501_v58 = vrot.slane %v2107_v10, 1  ;;  %v503_v60 = vrot.slane %v2110_v11, 1  ;;  %v1650_v0 = vcombine.low %v608_v61, %v2212_v62  ;;  %s2490_s20 = scalar_lea.vmem %s2552_s3, %s1959_s11 }
  0x1b   : > { %1803 = vmatpush3.bf16.msra.mxu0 %v523_v26  ;;  %1764 = vmatprep.mubr.msk.bf16.mxu0 %vm2034_vm1, %v2033_v1  ;;  %v500_v57 = vsel %vm495_vm4, %v497_v52, %v499_v56  ;;  %v505_v3 = vrot.slane %v2122_v19, 1  ;;  %v780_v7 = vshll.u32 %v2217_v2, 16  ;;  %v650_v9 = vrot.slane %v2217_v2, 1 }
  0x1c   : > { %1846 = vmatprep.subr.bf16.mxu0 %v2033_v1  ;;  %1776 = vmatprep.mubr.msk.bf16.mxu1 %vm2034_vm1, %v2033_v1  ;;  %v498_v54 = vsel %vm495_vm4, %v496_v51, %v497_v52  ;;  %v502_v59 = vsel %vm495_vm4, %v499_v56, %v501_v58  ;;  %v504_v63 = vsel %vm495_vm4, %v501_v58, %v503_v60  ;;  %v769_v4 = vshrl.u32 %v1650_v0, 16  ;;  %v1041_v58 = vld [vmem:[%s2091_s21 + $0x8] sm:$0xc] }
  0x1d   : > { %1824 = vmatprep.subr.bf16.mxu1 %v2033_v1  ;;  %v649_v8 = vrot.slane %v1650_v0, 1  ;;  %v782_v16 = vrot.slane %v780_v7, 2  ;;  %v786_v21 = vshrl.u32 %v2236_v18, 16  ;;  %v789_v22 = vshll.u32 %v2236_v18, 16  ;;  %v1694_v7 = vld [vmem:[%s2550_s1 + $0x20] sm:$0xf] }
  0x1e   : > { %v771_v13 = vrot.slane %v769_v4, 1  ;;  %vm767_vm5 = vsmask.f32 6400  ;;  %v652_v23 = vrot.slane %v2236_v18, 1  ;;  %v1109_v28 = vsel %vm326_vm0, %v1675_v24, 0 }
  0x1f   : > { %v651_v17 = vsel %vm495_vm4, %v649_v8, %v650_v9  ;;  %v788_v26 = vrot.slane %v786_v21, 1  ;;  %v791_v27 = vrot.slane %v789_v22, 2  ;;  %v795_v32 = vshrl.u32 %v2256_v30, 16 }
  0x20   : > { %v653_v29 = vsel %vm495_vm4, %v650_v9, %v652_v23  ;;  %v798_v33 = vshll.u32 %v2256_v30, 16  ;;  %v654_v34 = vrot.slane %v2256_v30, 1  ;;  %v807_v42 = vshll.u32 %v2146_v39, 16  ;;  %v2331_v9 = vld [vmem:[%s2091_s21 + $0x18] sm:$0xff]  }
  0x21   : > { %1777 = vmatmul.mubr.msk.bf16.gmra.mxu1 %vm310_vm3, %v309_v41  ;;  %v792_v31 = vor.u32 %v791_v27, %v788_v26  ;;  %v797_v36 = vrot.slane %v795_v32, 1  ;;  %v804_v41 = vshrl.u32 %v2146_v39, 16  ;;  %v813_v51 = vshrl.u32 %v2280_v48, 16 }
  0x22   : > { %1765 = vmatmul.mubr.msk.bf16.gmra.mxu0 %vm310_vm3, %v285_v37  ;;  %1782 = vmatprep.mubr.msk.bf16.mxu1 %vm2034_vm1, %v2033_v1  ;;  %v800_v37 = vrot.slane %v798_v33, 2  ;;  %v655_v38 = vsel %vm495_vm4, %v652_v23, %v654_v34  ;;  %v657_v49 = vsel %vm495_vm4, %v654_v34, %v656_v44  ;;  %v816_v52 = vshll.u32 %v2280_v48, 16 }
  0x23   : > { %1768 = vmatprep.mubr.msk.bf16.mxu0 %vm2034_vm1, %v2033_v1  ;;  %v806_v45 = vrot.slane %v804_v41, 1  ;;  %v1669_v56 = vcombine.low %v922_v53, %v2212_v62  ;;  %v930_v61 = vrot.slane %v2217_v2, 2  ;;  %v938_v23 = vrot.slane %v2280_v48, 2 }
  0x24   : > { %v801_v40 = vor.u32 %v800_v37, %v797_v36  ;;  %vm1200_vm7 = vsmask.f32 5376 }
  0x26   : > { %v802_v43 = vsel %vm767_vm5, %v792_v31, %v801_v40 }
  0x29   : > { %1783 = vmatmul.mubr.msk.bf16.vlgmr.msra.gmra.mxu1 %vm310_vm3, %v2098_v5  ;;  %v772_v5 = vshll.u32 %v1650_v0, 16 }
  0x2a   : > { %1769 = vmatmul.mubr.msk.bf16.gmra.mxu0 %vm310_vm3, %v293_v47  ;;  %1825 = vmatpush3.bf16.msra.mxu1 %v676_v50  ;;  %v809_v47 = vrot.slane %v807_v42, 2 }
  0x2b   : > { %1804 = vmatprep.mubr.msk.bf16.mxu0 %vm2034_vm1, %v2033_v1  ;;  %1786 = vmatprep.mubr.msk.bf16.mxu1 %vm2034_vm1, %v2033_v1  ;;  %v774_v14 = vrot.slane %v772_v5, 2 }
  0x2c   : > { %1868 = vmatprep.subr.bf16.mxu1 %v2033_v1  ;;  %v810_v50 = vor.u32 %v809_v47, %v806_v45 }
  0x2d   : > { %v775_v19 = vor.u32 %v774_v14, %v771_v13  ;;  %v1085_v13 = vrot.slane %v2331_v9, 2  ;;  %v934_v14 = vrot.slane %v2256_v30, 2 }
  0x2e   : > { %v811_v44 = vsel %vm767_vm5, %v801_v40, %v810_v50  ;;  %v1222_v40 = vshll.u32 %v2331_v9, 16 }
  0x30   : > { %v1224_v47 = vrot.slane %v1222_v40, 3 }
  0x31   : > { %1787 = vmatmul.mubr.msk.bf16.gmra.mxu1 %vm310_vm3, %v2101_v6  ;;  %v777_v6 = vshrl.u32 %v2217_v2, 16 }
  0x32   : > { %1805 = vmatmul.mubr.msk.bf16.vlgmr.msra.gmra.mxu0 %vm310_vm3, %v498_v54  ;;  %1790 = vmatprep.mubr.msk.bf16.mxu1 %vm2034_vm1, %v2033_v1  ;;  %v815_v54 = vrot.slane %v813_v51, 1 }
  0x33   : > { %1847 = vmatpush3.bf16.msra.mxu0 %v837_v55  ;;  %1808 = vmatprep.mubr.msk.bf16.mxu0 %vm2034_vm1, %v2033_v1  ;;  %v779_v15 = vrot.slane %v777_v6, 1  ;;  %v818_v55 = vrot.slane %v816_v52, 2  ;;  %v932_v6 = vrot.slane %v2236_v18, 2 }
  0x34   : > { %1890 = vmatprep.subr.bf16.mxu0 %v2033_v1 }
  0x35   : > { %v783_v20 = vor.u32 %v782_v16, %v779_v15  ;;  %v2345_v16 = vld [vmem:[%s2091_s21 + $0x20] sm:$0xff]  }
  0x36   : > { %v1087_v18 = vrot.slane %v2345_v16, 2  ;;  %v1228_v51 = vshrl.u32 %v2345_v16, 16  ;;  %v1231_v52 = vshll.u32 %v2345_v16, 16 }
  0x37   : > { %v784_v25 = vsel %vm767_vm5, %v775_v19, %v783_v20  ;;  %v793_v35 = vsel %vm767_vm5, %v783_v20, %v792_v31  ;;  %v2358_v20 = vld [vmem:[%s2091_s21 + $0x28] sm:$0xff]  }
  0x38   : > { %v1088_v19 = vsel %vm928_vm6, %v1085_v13, %v1087_v18  ;;  %v1089_v22 = vrot.slane %v2358_v20, 2 }
  0x39   : > { %1791 = vmatmul.mubr.msk.bf16.gmra.mxu1 %vm310_vm3, %v2113_v12  ;;  %v1668_v12 = vld [vmem:[%s2550_s1 + $0x14] sm:$0xf] }
  0x3a   : > { %1809 = vmatmul.mubr.msk.bf16.gmra.mxu0 %vm310_vm3, %v500_v57  ;;  %1794 = vmatprep.mubr.msk.bf16.mxu1 %vm2034_vm1, %v2033_v1  ;;  %v819_v57 = vor.u32 %v818_v55, %v815_v54  ;;  %v1090_v27 = vsel %vm928_vm6, %v1087_v18, %v1089_v22  ;;  %v1230_v54 = vrot.slane %v1228_v51, 2  ;;  %v1233_v55 = vrot.slane %v1231_v52, 3 }
  0x3b   : > { %1812 = vmatprep.mubr.msk.bf16.mxu0 %vm2034_vm1, %v2033_v1 }
  0x3c   : > { %v820_v62 = vsel %vm767_vm5, %v810_v50, %v819_v57  ;;  %v1234_v57 = vor.u32 %v1233_v55, %v1230_v54 }
  0x41   : > { %1795 = vmatmul.mubr.msk.bf16.gmra.mxu1 %vm310_vm3, %v2107_v10  ;;  %v506_v10 = vsel %vm495_vm4, %v503_v60, %v505_v3  ;;  %v929_v60 = vrot.slane %v1669_v56, 2  ;;  %v1365_v56 = vrot.slane %v2331_v9, 3 }
  0x42   : > { %1813 = vmatmul.mubr.msk.bf16.gmra.mxu0 %vm310_vm3, %v502_v59  ;;  %1798 = vmatprep.mubr.msk.bf16.mxu1 %vm2034_vm1, %v2033_v1  ;;  %v2303_v59 = vld [vmem:[%s2091_s21 + $0xc] sm:$0xf] }
  0x43   : > { %1816 = vmatprep.mubr.msk.bf16.mxu0 %vm2034_vm1, %v2033_v1  ;;  %v1676_v0 = vcombine.low %v1041_v58, %v2303_v59  ;;  %v931_v3 = vsel %vm928_vm6, %v929_v60, %v930_v61  ;;  %v1237_v58 = vshrl.u32 %v2358_v20, 16 }
  0x45   : > { %v1082_v2 = vrot.slane %v1676_v0, 2  ;;  %v1205_v24 = vshll.u32 %v1676_v0, 16 }
  0x47   : > { %v1207_v31 = vrot.slane %v1205_v24, 3 }
  0x49   : > { %1799 = vmatmul.mubr.msk.bf16.gmra.mxu1 %vm310_vm3, %v2110_v11  ;;  %v956_v11 = vsel %vm326_vm0, %v1668_v12, 0  ;;  %v933_v12 = vsel %vm928_vm6, %v930_v61, %v932_v6 }
  0x4a   : > { %1817 = vmatmul.mubr.msk.bf16.gmra.mxu0 %vm310_vm3, %v504_v63  ;;  %1826 = vmatprep.mubr.msk.bf16.mxu1 %vm2034_vm1, %v2033_v1  ;;  %v1687_v63 = vld [vmem:[%s2550_s1 + $0x1c] sm:$0xf] }
  0x4b   : > { %1820 = vmatprep.mubr.msk.bf16.mxu0 %vm2034_vm1, %v2033_v1  ;;  %v1270_v4 = vsel %vm326_vm0, %v1687_v63, 0 }
  0x51   : > { %1827 = vmatmul.mubr.msk.bf16.vlgmr.msra.gmra.mxu1 %vm310_vm3, %v651_v17  ;;  %v935_v17 = vsel %vm928_vm6, %v932_v6, %v934_v14 }
  0x52   : > { %1821 = vmatmul.mubr.msk.bf16.gmra.mxu0 %vm310_vm3, %v506_v10  ;;  %1869 = vmatpush3.bf16.msra.mxu1 %v956_v11  ;;  %v1389_v10 = vsel %vm326_vm0, %v1694_v7, 0  ;;  %v936_v11 = vrot.slane %v2146_v39, 2  ;;  %v1202_v39 = vshrl.u32 %v1676_v0, 16  ;;  %v2008_v0 = vld [vmem:[%s2091_s21 + $0x30] ss:$0 sps:$4 sm:$0x77]  }
  0x53   : > { %1848 = vmatprep.mubr.msk.bf16.mxu0 %vm2034_vm1, %v2033_v1  ;;  %1830 = vmatprep.mubr.msk.bf16.mxu1 %vm2034_vm1, %v2033_v1 }
  0x54   : > { %1912 = vmatprep.subr.bf16.mxu1 %v2033_v1  ;;  %v937_v21 = vsel %vm928_vm6, %v934_v14, %v936_v11  ;;  %v1204_v30 = vrot.slane %v1202_v39, 2  ;;  %v1371_v14 = vrot.slane %v2008_v0, 3 }
  0x56   : > { %v1208_v36 = vor.u32 %v1207_v31, %v1204_v30 }
  0x59   : > { %1831 = vmatmul.mubr.msk.bf16.gmra.mxu1 %vm310_vm3, %v653_v29  ;;  %v939_v29 = vsel %vm928_vm6, %v936_v11, %v938_v23 }
  0x5a   : > { %1849 = vmatmul.mubr.msk.bf16.vlgmr.msra.gmra.mxu0 %vm310_vm3, %v784_v25  ;;  %1834 = vmatprep.mubr.msk.bf16.mxu1 %vm2034_vm1, %v2033_v1 }
  0x5b   : > { %1891 = vmatpush3.bf16.msra.mxu0 %v1109_v28  ;;  %1852 = vmatprep.mubr.msk.bf16.mxu0 %vm2034_vm1, %v2033_v1  ;;  %v2006_v28 = vld [vmem:[%s2091_s21 + $0x30] ss:$0 sps:$4 sm:$0x33]  }
  0x5c   : > { %1934 = vmatprep.subr.bf16.mxu0 %v2033_v1  ;;  %v1091_v34 = vrot.slane %v2006_v28, 2 }
  0x5e   : > { %v1092_v41 = vsel %vm928_vm6, %v1089_v22, %v1091_v34 }
  0x61   : > { %1835 = vmatmul.mubr.msk.bf16.gmra.mxu1 %vm310_vm3, %v655_v38  ;;  %v1219_v38 = vshrl.u32 %v2331_v9, 16  ;;  %v1369_v9 = vrot.slane %v2358_v20, 3 }
  0x62   : > { %1853 = vmatmul.mubr.msk.bf16.gmra.mxu0 %vm310_vm3, %v793_v35  ;;  %1838 = vmatprep.mubr.msk.bf16.mxu1 %vm2034_vm1, %v2033_v1  ;;  %v1355_v35 = vld [vmem:[%s2091_s21 + $0x8] sm:$0x8] }
  0x63   : > { %1856 = vmatprep.mubr.msk.bf16.mxu0 %vm2034_vm1, %v2033_v1  ;;  %v1695_v42 = vcombine.low %v1355_v35, %v2303_v59  ;;  %v1221_v45 = vrot.slane %v1219_v38, 2  ;;  %v1240_v59 = vshll.u32 %v2358_v20, 16 }
  0x65   : > { %v1362_v48 = vrot.slane %v1695_v42, 3  ;;  %v1225_v50 = vor.u32 %v1224_v47, %v1221_v45  ;;  %v1242_v63 = vrot.slane %v1240_v59, 3 }
  0x67   : > { %v1235_v61 = vsel %vm1200_vm7, %v1225_v50, %v1234_v57 }
  0x69   : > { %1839 = vmatmul.mubr.msk.bf16.gmra.mxu1 %vm310_vm3, %v657_v49 }
  0x6a   : > { %1857 = vmatmul.mubr.msk.bf16.gmra.mxu0 %vm310_vm3, %v802_v43  ;;  %1842 = vmatprep.mubr.msk.bf16.mxu1 %vm2034_vm1, %v2033_v1 }
  0x6b   : > { %1860 = vmatprep.mubr.msk.bf16.mxu0 %vm2034_vm1, %v2033_v1 }
  0x71   : > { %1843 = vmatmul.mubr.msk.bf16.gmra.mxu1 %vm310_vm3, %v2161_v46  ;;  %v2314_v46 = vld [vmem:[%s2091_s21 + $0x10] sm:$0xff]  }
  0x72   : > { %1861 = vmatmul.mubr.msk.bf16.gmra.mxu0 %vm310_vm3, %v811_v44  ;;  %1870 = vmatprep.mubr.msk.bf16.mxu1 %vm2034_vm1, %v2033_v1  ;;  %v1083_v5 = vrot.slane %v2314_v46, 2  ;;  %v1210_v25 = vshrl.u32 %v2314_v46, 16  ;;  %v1213_v26 = vshll.u32 %v2314_v46, 16  ;;  %v1363_v49 = vrot.slane %v2314_v46, 3 }
  0x73   : > { %1864 = vmatprep.mubr.msk.bf16.mxu0 %vm2034_vm1, %v2033_v1  ;;  %v1367_v46 = vrot.slane %v2345_v16, 3 }
  0x74   : > { %v1084_v8 = vsel %vm928_vm6, %v1082_v2, %v1083_v5  ;;  %v1086_v15 = vsel %vm928_vm6, %v1083_v5, %v1085_v13  ;;  %v1212_v32 = vrot.slane %v1210_v25, 2  ;;  %v1215_v33 = vrot.slane %v1213_v26, 3 }
  0x75   : > { %v1364_v53 = vsel %vm1361_vm8, %v1362_v48, %v1363_v49  ;;  %v1366_v60 = vsel %vm1361_vm8, %v1363_v49, %v1365_v56  ;;  %v1249_v2 = vshll.u32 %v2008_v0, 16  ;;  %v1368_v5 = vsel %vm1361_vm8, %v1365_v56, %v1367_v46 }
  0x76   : > { %v1216_v37 = vor.u32 %v1215_v33, %v1212_v32 }
  0x78   : > { %v1217_v43 = vsel %vm1200_vm7, %v1208_v36, %v1216_v37  ;;  %v1226_v44 = vsel %vm1200_vm7, %v1216_v37, %v1225_v50 }
  0x79   : > { %1871 = vmatmul.mubr.msk.bf16.vlgmr.msra.gmra.mxu1 %vm310_vm3, %v931_v3 }
  0x7a   : > { %1865 = vmatmul.mubr.msk.bf16.gmra.mxu0 %vm310_vm3, %v820_v62  ;;  %1913 = vmatpush3.bf16.msra.mxu1 %v1270_v4  ;;  %v1239_v62 = vrot.slane %v1237_v58, 2  ;;  %v1246_v4 = vshrl.u32 %v2008_v0, 16 }
  0x7b   : > { %1892 = vmatprep.mubr.msk.bf16.mxu0 %vm2034_vm1, %v2033_v1  ;;  %1874 = vmatprep.mubr.msk.bf16.mxu1 %vm2034_vm1, %v2033_v1 }
  0x7c   : > { %v1243_v3 = vor.u32 %v1242_v63, %v1239_v62  ;;  %v1248_v7 = vrot.slane %v1246_v4, 2 }
  0x7e   : > { %v1244_v6 = vsel %vm1200_vm7, %v1234_v57, %v1243_v3 }
  0x81   : > { %1875 = vmatmul.mubr.msk.bf16.gmra.mxu1 %vm310_vm3, %v933_v12  ;;  %v1370_v12 = vsel %vm1361_vm8, %v1367_v46, %v1369_v9 }
  0x82   : > { %1893 = vmatmul.mubr.msk.bf16.vlgmr.msra.gmra.mxu0 %vm310_vm3, %v1084_v8  ;;  %1878 = vmatprep.mubr.msk.bf16.mxu1 %vm2034_vm1, %v2033_v1  ;;  %v1251_v8 = vrot.slane %v1249_v2, 3 }
  0x83   : > { %1935 = vmatpush3.bf16.msra.mxu0 %v1389_v10  ;;  %1896 = vmatprep.mubr.msk.bf16.mxu0 %vm2034_vm1, %v2033_v1 }
  0x84   : > { %v1252_v10 = vor.u32 %v1251_v8, %v1248_v7 }
  0x86   : > { %v1253_v13 = vsel %vm1200_vm7, %v1243_v3, %v1252_v10 }
  0x89   : > { %1879 = vmatmul.mubr.msk.bf16.gmra.mxu1 %vm310_vm3, %v935_v17 }
  0x8a   : > { %1897 = vmatmul.mubr.msk.bf16.gmra.mxu0 %vm310_vm3, %v1086_v15  ;;  %1882 = vmatprep.mubr.msk.bf16.mxu1 %vm2034_vm1, %v2033_v1  ;;  %v1372_v15 = vsel %vm1361_vm8, %v1369_v9, %v1371_v14 }
  0x8b   : > { %1900 = vmatprep.mubr.msk.bf16.mxu0 %vm2034_vm1, %v2033_v1 }
  0x91   : > { %1883 = vmatmul.mubr.msk.bf16.gmra.mxu1 %vm310_vm3, %v937_v21 }
  0x92   : > { %1901 = vmatmul.mubr.msk.bf16.gmra.mxu0 %vm310_vm3, %v1088_v19  ;;  %1886 = vmatprep.mubr.msk.bf16.mxu1 %vm2034_vm1, %v2033_v1 }
  0x93   : > { %1904 = vmatprep.mubr.msk.bf16.mxu0 %vm2034_vm1, %v2033_v1 }
  0x99   : > { %1887 = vmatmul.mubr.msk.bf16.gmra.mxu1 %vm310_vm3, %v939_v29 }
  0x9a   : > { %1905 = vmatmul.mubr.msk.bf16.gmra.mxu0 %vm310_vm3, %v1090_v27  ;;  %1914 = vmatprep.mubr.msk.bf16.mxu1 %vm2034_vm1, %v2033_v1 }
  0x9b   : > { %1908 = vmatprep.mubr.msk.bf16.mxu0 %vm2034_vm1, %v2033_v1 }
  0xa1   : > { %1915 = vmatmul.mubr.msk.bf16.vlgmr.msra.gmra.mxu1 %vm310_vm3, %v1217_v43 }
  0xa2   : > { %1909 = vmatmul.mubr.msk.bf16.gmra.mxu0 %vm310_vm3, %v1092_v41  ;;  %1918 = vmatprep.mubr.msk.bf16.mxu1 %vm2034_vm1, %v2033_v1 }
  0xa3   : > { %1936 = vmatprep.mubr.msk.bf16.mxu0 %vm2034_vm1, %v2033_v1 }
  0xa9   : > { %1919 = vmatmul.mubr.msk.bf16.gmra.mxu1 %vm310_vm3, %v1226_v44 }
  0xaa   : > { %1937 = vmatmul.mubr.msk.bf16.vlgmr.msra.gmra.mxu0 %vm310_vm3, %v1364_v53  ;;  %1922 = vmatprep.mubr.msk.bf16.mxu1 %vm2034_vm1, %v2033_v1 }
  0xab   : > { %1940 = vmatprep.mubr.msk.bf16.mxu0 %vm2034_vm1, %v2033_v1 }
  0xb1   : > { %1923 = vmatmul.mubr.msk.bf16.gmra.mxu1 %vm310_vm3, %v1235_v61 }
  0xb2   : > { %1941 = vmatmul.mubr.msk.bf16.gmra.mxu0 %vm310_vm3, %v1366_v60  ;;  %1926 = vmatprep.mubr.msk.bf16.mxu1 %vm2034_vm1, %v2033_v1 }
  0xb3   : > { %1944 = vmatprep.mubr.msk.bf16.mxu0 %vm2034_vm1, %v2033_v1 }
  0xb9   : > { %1927 = vmatmul.mubr.msk.bf16.gmra.mxu1 %vm310_vm3, %v1244_v6 }
  0xba   : > { %1945 = vmatmul.mubr.msk.bf16.gmra.mxu0 %vm310_vm3, %v1368_v5  ;;  %1930 = vmatprep.mubr.msk.bf16.mxu1 %vm2034_vm1, %v2033_v1 }
  0xbb   : > { %1948 = vmatprep.mubr.msk.bf16.mxu0 %vm2034_vm1, %v2033_v1 }
  0xc1   : > { %1931 = vmatmul.mubr.msk.bf16.gmra.mxu1 %vm310_vm3, %v1253_v13 }
  0xc2   : > { %1949 = vmatmul.mubr.msk.bf16.gmra.mxu0 %vm310_vm3, %v1370_v12 }
  0xc3   : > { %1952 = vmatprep.mubr.msk.bf16.mxu0 %vm2034_vm1, %v2033_v1 }
  0xca   : > { %1953 = vmatmul.mubr.msk.bf16.gmra.mxu0 %vm310_vm3, %v1372_v15 }
  0xd9   : > { %v388_v17 = vpop.f32.mrf.mxu1 }
  0xda   : > { %v364_v16 = vpop.f32.mrf.mxu0 }
  0xdb   : > { %v1774_v11 = vpop.f32.mrf.mxu1 }
  0xdc   : > { %v1762_v18 = vpop.f32.mrf.mxu0 }
  0xdd   : > { %v391_v20 = vpop.f32.mrf.mxu1 }
  0xde   : > { %v367_v19 = vpop.f32.mrf.mxu0 }
  0xdf   : > { %v1775_v22 = vpop.f32.mrf.mxu1 }
  0xe0   : > { %v1763_v21 = vpop.f32.mrf.mxu0 }
  0xe1   : > { %v396_v39 = vpop.f32.mrf.mxu1 }
  0xe2   : > { %v372_v23 = vpop.f32.mrf.mxu0 }
  0xe3   : > { %v1778_v25 = vpop.f32.mrf.mxu1 }
  0xe4   : > { %v1766_v24 = vpop.f32.mrf.mxu0 }
  0xe5   : > { %v399_v26 = vpop.f32.mrf.mxu1 }
  0xe6   : > { %v375_v1 = vpop.f32.mrf.mxu0 }
  0xe7   : > { %v1779_v28 = vpop.f32.mrf.mxu1 }
  0xe8   : > { %v1767_v27 = vpop.f32.mrf.mxu0 }
  0xe9   : > { %v450_v30 = vpop.f32.mrf.mxu1 }
  0xea   : > { %v380_v29 = vpop.f32.mrf.mxu0  ;;  %v451_v32 = vadd.f32 %v450_v30, %v364_v16 }
  0xeb   : > { %v1784_v33 = vpop.f32.mrf.mxu1 }
  0xec   : > { %v1770_v31 = vpop.f32.mrf.mxu0 }
  0xed   : > { %v453_v35 = vpop.f32.mrf.mxu1 }
  0xee   : > { %v383_v34 = vpop.f32.mrf.mxu0  ;;  %v454_v37 = vadd.f32 %v453_v35, %v367_v19 }
  0xef   : > { %v1785_v38 = vpop.f32.mrf.mxu1 }
  0xf0   : > { %v1771_v36 = vpop.f32.mrf.mxu0 }
  0xf1   : > { %v458_v42 = vpop.f32.mrf.mxu1 }
  0xf2   : > { %v559_v40 = vpop.f32.mrf.mxu0  ;;  %v459_v45 = vadd.f32 %v458_v42, %v372_v23 }
  0xf3   : > { %v598_v41 = vadd.f32 %v559_v40, %v451_v32  ;;  %v1788_v47 = vpop.f32.mrf.mxu1 }
  0xf4   : > { %v1806_v43 = vpop.f32.mrf.mxu0 }
  0xf5   : > { %v461_v50 = vpop.f32.mrf.mxu1 }
  0xf6   : > { %v562_v48 = vpop.f32.mrf.mxu0  ;;  %v462_v52 = vadd.f32 %v461_v50, %v375_v1 }
  0xf7   : > { %v599_v49 = vadd.f32 %v562_v48, %v454_v37  ;;  %v1789_v53 = vpop.f32.mrf.mxu1 }
  0xf8   : > { %v1807_v51 = vpop.f32.mrf.mxu0 }
  0xf9   : > { %v466_v55 = vpop.f32.mrf.mxu1 }
  0xfa   : > { %v567_v44 = vpop.f32.mrf.mxu0  ;;  %v467_v57 = vadd.f32 %v466_v55, %v380_v29 }
  0xfb   : > { %v600_v54 = vadd.f32 %v567_v44, %v459_v45  ;;  %v1792_v58 = vpop.f32.mrf.mxu1 }
  0xfc   : > { %v1810_v56 = vpop.f32.mrf.mxu0 }
  0xfd   : > { %v469_v61 = vpop.f32.mrf.mxu1 }
  0xfe   : > { %v570_v59 = vpop.f32.mrf.mxu0  ;;  %v470_v63 = vadd.f32 %v469_v61, %v383_v34 }
  0xff   : > { %v601_v60 = vadd.f32 %v570_v59, %v462_v52  ;;  %v1793_v0 = vpop.f32.mrf.mxu1 }
 0x100   : > { %v1811_v62 = vpop.f32.mrf.mxu0 }
 0x101   : > { %v474_v4 = vpop.f32.mrf.mxu1 }
 0x102   : > { %v575_v46 = vpop.f32.mrf.mxu0  ;;  %v475_v5 = vadd.f32 %v474_v4, %v388_v17 }
 0x103   : > { %v602_v3 = vadd.f32 %v575_v46, %v467_v57  ;;  %v1796_v6 = vpop.f32.mrf.mxu1 }
 0x104   : > { %v1814_v2 = vpop.f32.mrf.mxu0 }
 0x105   : > { %v477_v9 = vpop.f32.mrf.mxu1 }
 0x106   : > { %v578_v7 = vpop.f32.mrf.mxu0  ;;  %v478_v12 = vadd.f32 %v477_v9, %v391_v20 }
 0x107   : > { %v603_v8 = vadd.f32 %v578_v7, %v470_v63  ;;  %v1797_v13 = vpop.f32.mrf.mxu1 }
 0x108   : > { %v1815_v10 = vpop.f32.mrf.mxu0 }
 0x109   : > { %v482_v16 = vpop.f32.mrf.mxu1 }
 0x10a   : > { %v583_v14 = vpop.f32.mrf.mxu0  ;;  %v483_v11 = vadd.f32 %v482_v16, %v396_v39 }
 0x10b   : > { %v604_v15 = vadd.f32 %v583_v14, %v475_v5  ;;  %v1800_v19 = vpop.f32.mrf.mxu1 }
 0x10c   : > { %v1818_v18 = vpop.f32.mrf.mxu0 }
 0x10d   : > { %v485_v23 = vpop.f32.mrf.mxu1 }
 0x10e   : > { %v586_v21 = vpop.f32.mrf.mxu0  ;;  %v486_v25 = vadd.f32 %v485_v23, %v399_v26 }
 0x10f   : > { %v605_v22 = vadd.f32 %v586_v21, %v478_v12  ;;  %v1801_v1 = vpop.f32.mrf.mxu1 }
 0x110   : > { %v1819_v24 = vpop.f32.mrf.mxu0 }
 0x111   : > { %v712_v28 = vpop.f32.mrf.mxu1 }
 0x112   : > { %v591_v17 = vpop.f32.mrf.mxu0  ;;  %v751_v30 = vadd.f32 %v712_v28, %v598_v41 }
 0x113   : > { %v606_v27 = vadd.f32 %v591_v17, %v483_v11  ;;  %v1828_v31 = vpop.f32.mrf.mxu1 }
 0x114   : > { %v1822_v29 = vpop.f32.mrf.mxu0 }
 0x115   : > { %v715_v33 = vpop.f32.mrf.mxu1 }
 0x116   : > { %v594_v20 = vpop.f32.mrf.mxu0  ;;  %v752_v35 = vadd.f32 %v715_v33, %v599_v49 }
 0x117   : > { %v607_v32 = vadd.f32 %v594_v20, %v486_v25  ;;  %v1829_v36 = vpop.f32.mrf.mxu1 }
 0x118   : > { %v1823_v34 = vpop.f32.mrf.mxu0 }
 0x119   : > { %v720_v38 = vpop.f32.mrf.mxu1 }
 0x11a   : > { %v873_v39 = vpop.f32.mrf.mxu0  ;;  %v753_v42 = vadd.f32 %v720_v38, %v600_v54 }
 0x11b   : > { %v2433_v37 = vadd.f32 %v873_v39, %v751_v30  ;;  %v1832_v26 = vpop.f32.mrf.mxu1 }
 0x11c   : > { %v1850_v40 = vpop.f32.mrf.mxu0 }
 0x11d   : > { %v723_v47 = vpop.f32.mrf.mxu1 }
 0x11e   : > { %v876_v43 = vpop.f32.mrf.mxu0  ;;  %v754_v41 = vadd.f32 %v723_v47, %v601_v60 }
 0x11f   : > { %v2435_v45 = vadd.f32 %v876_v43, %v752_v35  ;;  %v1833_v50 = vpop.f32.mrf.mxu1 }
 0x120   : > { %v1851_v48 = vpop.f32.mrf.mxu0 }
 0x121   : > { %v728_v53 = vpop.f32.mrf.mxu1 }
 0x122   : > { %v881_v51 = vpop.f32.mrf.mxu0  ;;  %v755_v44 = vadd.f32 %v728_v53, %v602_v3 }
 0x123   : > { %v2437_v52 = vadd.f32 %v881_v51, %v753_v42  ;;  %v1836_v55 = vpop.f32.mrf.mxu1 }
 0x124   : > { %v1854_v49 = vpop.f32.mrf.mxu0 }
 0x125   : > { %v731_v58 = vpop.f32.mrf.mxu1 }
 0x126   : > { %v884_v56 = vpop.f32.mrf.mxu0  ;;  %v756_v59 = vadd.f32 %v731_v58, %v603_v8 }
 0x127   : > { %v2439_v57 = vadd.f32 %v884_v56, %v754_v41  ;;  %v1837_v61 = vpop.f32.mrf.mxu1 }
 0x128   : > { %v1855_v54 = vpop.f32.mrf.mxu0 }
 0x129   : > { %v736_v0 = vpop.f32.mrf.mxu1 }
 0x12a   : > { %v889_v62 = vpop.f32.mrf.mxu0  ;;  %v757_v46 = vadd.f32 %v736_v0, %v604_v15 }
 0x12b   : > { %v2441_v63 = vadd.f32 %v889_v62, %v755_v44  ;;  %v1840_v4 = vpop.f32.mrf.mxu1 }
 0x12c   : > { %v1858_v60 = vpop.f32.mrf.mxu0 }
 0x12d   : > { %v739_v6 = vpop.f32.mrf.mxu1 }
 0x12e   : > { %v892_v2 = vpop.f32.mrf.mxu0  ;;  %v758_v7 = vadd.f32 %v739_v6, %v605_v22 }
 0x12f   : > { %v2443_v5 = vadd.f32 %v892_v2, %v756_v59  ;;  %v1841_v9 = vpop.f32.mrf.mxu1 }
 0x130   : > { %v1859_v3 = vpop.f32.mrf.mxu0 }
 0x131   : > { %v744_v13 = vpop.f32.mrf.mxu1 }
 0x132   : > { %v897_v10 = vpop.f32.mrf.mxu0  ;;  %v759_v14 = vadd.f32 %v744_v13, %v606_v27 }
 0x133   : > { %v2445_v12 = vadd.f32 %v897_v10, %v757_v46  ;;  %v1844_v16 = vpop.f32.mrf.mxu1 }
 0x134   : > { %v1862_v8 = vpop.f32.mrf.mxu0 }
 0x135   : > { %v747_v19 = vpop.f32.mrf.mxu1 }
 0x136   : > { %v900_v18 = vpop.f32.mrf.mxu0  ;;  %v760_v21 = vadd.f32 %v747_v19, %v607_v32 }
 0x137   : > { %v2447_v11 = vadd.f32 %v900_v18, %v758_v7  ;;  %v1845_v23 = vpop.f32.mrf.mxu1 }
 0x138   : > { %v1863_v15 = vpop.f32.mrf.mxu0  ;;  %v2483_v23 = vld [vmem:[%s2551_s2] ss:$0 sm:$0xff] }
 0x139   : > { %v992_v1 = vpop.f32.mrf.mxu1 }
 0x13a   : > { %v905_v24 = vpop.f32.mrf.mxu0  ;;  %v1031_v9 = vadd.f32 %v992_v1, %v2433_v37 }
 0x13b   : > { %v2449_v25 = vadd.f32 %v905_v24, %v759_v14  ;;  %v1872_v17 = vpop.f32.mrf.mxu1 }
 0x13c   : > { %v1866_v22 = vpop.f32.mrf.mxu0 }
 0x13d   : > { %v995_v30 = vpop.f32.mrf.mxu1 }
 0x13e   : > { %v908_v28 = vpop.f32.mrf.mxu0  ;;  %v1032_v18 = vadd.f32 %v995_v30, %v2435_v45 }
 0x13f   : > { %v2451_v29 = vadd.f32 %v908_v28, %v760_v21  ;;  %v1873_v27 = vpop.f32.mrf.mxu1 }
 0x140   : > { %v1867_v31 = vpop.f32.mrf.mxu0 }
 0x141   : > { %v1000_v33 = vpop.f32.mrf.mxu1 }
 0x142   : > { %v1145_v20 = vpop.f32.mrf.mxu0  ;;  %v1033_v17 = vadd.f32 %v1000_v33, %v2437_v52 }
 0x143   : > { %v1876_v35 = vpop.f32.mrf.mxu1  ;;  %v1184_v8 = vadd.f32 %v1145_v20, %v1031_v9 }
 0x144   : > { %v1894_v34 = vpop.f32.mrf.mxu0 }
 0x145   : > { %v1003_v39 = vpop.f32.mrf.mxu1 }
 0x146   : > { %v1148_v36 = vpop.f32.mrf.mxu0 }
 0x147   : > { %v1877_v38 = vpop.f32.mrf.mxu1  ;;  %v1185_v24 = vadd.f32 %v1148_v36, %v1032_v18 }
 0x148   : > { %v1895_v32 = vpop.f32.mrf.mxu0 }
 0x149   : > { %v2453_v42 = vpop.f32.mrf.mxu1  ;;  %v1034_v32 = vadd.f32 %v1003_v39, %v2439_v57 }
 0x14a   : > { %v1153_v40 = vpop.f32.mrf.mxu0 }
 0x14b   : > { %v1880_v43 = vpop.f32.mrf.mxu1  ;;  %v1186_v27 = vadd.f32 %v1153_v40, %v1033_v17 }
 0x14c   : > { %v1898_v26 = vpop.f32.mrf.mxu0 }
 0x14d   : > { %v2455_v48 = vpop.f32.mrf.mxu1 }
 0x14e   : > { %v1156_v47 = vpop.f32.mrf.mxu0 }
 0x14f   : > { %v1881_v50 = vpop.f32.mrf.mxu1  ;;  %v1187_v43 = vadd.f32 %v1156_v47, %v1034_v32 }
 0x150   : > { %v1899_v41 = vpop.f32.mrf.mxu0 }
 0x151   : > { %v2459_v53 = vpop.f32.mrf.mxu1 }
 0x152   : > { %v2457_v51 = vpop.f32.mrf.mxu0  ;;  %v1037_v18 = vadd.f32 %v2459_v53, %v2445_v12 }
 0x153   : > { %v1884_v44 = vpop.f32.mrf.mxu1 }
 0x154   : > { %v1902_v49 = vpop.f32.mrf.mxu0  ;;  %v1035_v44 = vadd.f32 %v2453_v42, %v2441_v63 }
 0x155   : > { %v2463_v56 = vpop.f32.mrf.mxu1 }
 0x156   : > { %v2461_v55 = vpop.f32.mrf.mxu0 }
 0x157   : > { %v1885_v54 = vpop.f32.mrf.mxu1 }
 0x158   : > { %v1903_v58 = vpop.f32.mrf.mxu0 }
 0x159   : > { %v2467_v61 = vpop.f32.mrf.mxu1 }
 0x15a   : > { %v2465_v59 = vpop.f32.mrf.mxu0 }
 0x15b   : > { %v1888_v0 = vpop.f32.mrf.mxu1 }
 0x15c   : > { %v1906_v62 = vpop.f32.mrf.mxu0 }
 0x15d   : > { %v2471_v46 = vpop.f32.mrf.mxu1  ;;  %v1188_v62 = vadd.f32 %v2457_v51, %v1035_v44 }
 0x15e   : > { %v2469_v60 = vpop.f32.mrf.mxu0 }
 0x15f   : > { %v1889_v2 = vpop.f32.mrf.mxu1 }
 0x160   : > { %v1907_v4 = vpop.f32.mrf.mxu0 }
 0x161   : > { %v1306_v3 = vpop.f32.mrf.mxu1 }
 0x162   : > { %v2473_v6 = vpop.f32.mrf.mxu0  ;;  %v1345_v19 = vadd.f32 %v1306_v3, %v1184_v8  ;;  %v1036_v3 = vadd.f32 %v2455_v48, %v2443_v5 }
 0x163   : > { %v1916_v10 = vpop.f32.mrf.mxu1 }
 0x164   : > { %v1910_v7 = vpop.f32.mrf.mxu0  ;;  %v1189_v10 = vadd.f32 %v2461_v55, %v1036_v3 }
 0x165   : > { %v1309_v14 = vpop.f32.mrf.mxu1 }
 0x166   : > { %v2476_v13 = vpop.f32.mrf.mxu0  ;;  %v1346_v28 = vadd.f32 %v1309_v14, %v1185_v24 }
 0x167   : > { %v1917_v15 = vpop.f32.mrf.mxu1 }
 0x168   : > { %v1911_v16 = vpop.f32.mrf.mxu0 }
 0x169   : > { %v1314_v37 = vpop.f32.mrf.mxu1 }
 0x16a   : > { %v1425_v21 = vpop.f32.mrf.mxu0  ;;  %v1347_v52 = vadd.f32 %v1314_v37, %v1186_v27 }
 0x16b   : > { %v1464_v22 = vadd.f32 %v1425_v21, %v1345_v19  ;;  %v1920_v45 = vpop.f32.mrf.mxu1  ;;  %v1190_v21 = vadd.f32 %v2465_v59, %v1037_v18 }
 0x16c   : > { %v1938_v1 = vpop.f32.mrf.mxu0 }
 0x16d   : > { %v1481_v31 = vadd.f32 %v2483_v23, %v1464_v22  ;;  %v1317_v35 = vpop.f32.mrf.mxu1  ;;  %v1038_v1 = vadd.f32 %v2463_v56, %v2447_v11 }
 0x16e   : > { %v1428_v30 = vpop.f32.mrf.mxu0  ;;  %v1348_v58 = vadd.f32 %v1317_v35, %v1187_v43 }
 0x16f   : > { %v1491_v20 = vmax.f32 %v1481_v31, 0.0  ;;  %v1465_v34 = vadd.f32 %v1428_v30, %v1346_v28  ;;  %v1921_v38 = vpop.f32.mrf.mxu1  ;;  %v1191_v31 = vadd.f32 %v2469_v60, %v1038_v1 }
 0x170   : > { %v1939_v36 = vpop.f32.mrf.mxu0  ;;  %v1040_v38 = vadd.f32 %v2471_v46, %v2451_v29 }
 0x171   : > { %1501 = vst.msk [vmem:[%s2490_s20] sm:$0xff] %vm310_vm3, %v1491_v20  ;;  %v1482_v33 = vadd.f32 %v2483_v23, %v1465_v34  ;;  %v1322_v49 = vpop.f32.mrf.mxu1  ;;  %v1039_v20 = vadd.f32 %v2467_v61, %v2449_v25 }
 0x172   : > { %v1433_v26 = vpop.f32.mrf.mxu0  ;;  %v1349_v7 = vadd.f32 %v1322_v49, %v1188_v62 }
 0x173   : > { %v1492_v41 = vmax.f32 %v1482_v33, 0.0  ;;  %v1466_v50 = vadd.f32 %v1433_v26, %v1347_v52  ;;  %v1924_v39 = vpop.f32.mrf.mxu1  ;;  %v1192_v36 = vadd.f32 %v2473_v6, %v1039_v20 }
 0x174   : > { %v1942_v40 = vpop.f32.mrf.mxu0 }
 0x175   : > { %1502 = vst.msk [vmem:[%s2490_s20 + $0x8] sm:$0xff] %vm310_vm3, %v1492_v41  ;;  %v1483_v57 = vadd.f32 %v2483_v23, %v1466_v50  ;;  %v1325_v47 = vpop.f32.mrf.mxu1  ;;  %v1193_v41 = vadd.f32 %v2476_v13, %v1040_v38 }
 0x176   : > { %v1436_v54 = vpop.f32.mrf.mxu0  ;;  %v1350_v19 = vadd.f32 %v1325_v47, %v1189_v10 }
 0x177   : > { %v1493_v0 = vmax.f32 %v1483_v57, 0.0  ;;  %v1467_v4 = vadd.f32 %v1436_v54, %v1348_v58  ;;  %v1925_v42 = vpop.f32.mrf.mxu1 }
 0x178   : > { %v1943_v2 = vpop.f32.mrf.mxu0 }
 0x179   : > { %1503 = vst.msk [vmem:[%s2490_s20 + $0x10] sm:$0xff] %vm310_vm3, %v1493_v0  ;;  %v1484_v63 = vadd.f32 %v2483_v23, %v1467_v4  ;;  %v1330_v51 = vpop.f32.mrf.mxu1 }
 0x17a   : > { %v1441_v9 = vpop.f32.mrf.mxu0  ;;  %v1351_v17 = vadd.f32 %v1330_v51, %v1190_v21 }
 0x17b   : > { %v1494_v8 = vmax.f32 %v1484_v63, 0.0  ;;  %v1468_v14 = vadd.f32 %v1441_v9, %v1349_v7  ;;  %v1928_v48 = vpop.f32.mrf.mxu1 }
 0x17c   : > { %v1946_v16 = vpop.f32.mrf.mxu0 }
 0x17d   : > { %1504 = vst.msk [vmem:[%s2490_s20 + $0x18] sm:$0xff] %vm310_vm3, %v1494_v8  ;;  %v1485_v5 = vadd.f32 %v2483_v23, %v1468_v14  ;;  %v1333_v55 = vpop.f32.mrf.mxu1 }
 0x17e   : > { %v1444_v15 = vpop.f32.mrf.mxu0  ;;  %v1352_v34 = vadd.f32 %v1333_v55, %v1191_v31 }
 0x17f   : > { %v1495_v24 = vmax.f32 %v1485_v5, 0.0  ;;  %v1469_v22 = vadd.f32 %v1444_v15, %v1350_v19  ;;  %v1929_v53 = vpop.f32.mrf.mxu1 }
 0x180   : > { %v1947_v37 = vpop.f32.mrf.mxu0 }
 0x181   : > { %1505 = vst.msk [vmem:[%s2490_s20 + $0x20] sm:$0xff] %vm310_vm3, %v1495_v24  ;;  %v1486_v12 = vadd.f32 %v2483_v23, %v1469_v22  ;;  %v1338_v59 = vpop.f32.mrf.mxu1 }
 0x182   : > { %v1449_v28 = vpop.f32.mrf.mxu0  ;;  %v1353_v26 = vadd.f32 %v1338_v59, %v1192_v36 }
 0x183   : > { %v1496_v45 = vmax.f32 %v1486_v12, 0.0  ;;  %v1470_v30 = vadd.f32 %v1449_v28, %v1351_v17  ;;  %v1932_v56 = vpop.f32.mrf.mxu1 }
 0x184   : > { %v1950_v27 = vpop.f32.mrf.mxu0 }
 0x185   : > { %1506 = vst.msk [vmem:[%s2490_s20 + $0x28] sm:$0xff] %vm310_vm3, %v1496_v45  ;;  %v1487_v11 = vadd.f32 %v2483_v23, %v1470_v30  ;;  %v1341_v52 = vpop.f32.mrf.mxu1 }
 0x186   : > { %v1452_v35 = vpop.f32.mrf.mxu0  ;;  %v1354_v40 = vadd.f32 %v1341_v52, %v1193_v41 }
 0x187   : > { %v1497_v32 = vmax.f32 %v1487_v11, 0.0  ;;  %v1471_v60 = vadd.f32 %v1452_v35, %v1352_v34  ;;  %v1933_v61 = vpop.f32.mrf.mxu1 }
 0x188   : > { %v1951_v33 = vpop.f32.mrf.mxu0 }
 0x189   : > { %1507 = vst.msk [vmem:[%s2490_s20 + $0x30] sm:$0xff] %vm310_vm3, %v1497_v32  ;;  %v1488_v25 = vadd.f32 %v2483_v23, %v1471_v60 }
 0x18a   : > { %v1457_v43 = vpop.f32.mrf.mxu0 }
 0x18b   : > { %v1498_v6 = vmax.f32 %v1488_v25, 0.0  ;;  %v1472_v50 = vadd.f32 %v1457_v43, %v1353_v26 }
 0x18c   : > { %v1954_v49 = vpop.f32.mrf.mxu0 }
 0x18d   : > { %1508 = vst.msk [vmem:[%s2490_s20 + $0x38] sm:$0xff] %vm310_vm3, %v1498_v6  ;;  %v1489_v44 = vadd.f32 %v2483_v23, %v1472_v50 }
 0x18e   : > { %v1460_v29 = vpop.f32.mrf.mxu0 }
 0x18f   : > { %v1499_v46 = vmax.f32 %v1489_v44, 0.0  ;;  %v1473_v58 = vadd.f32 %v1460_v29, %v1354_v40 }
 0x190   : > { %v1955_v57 = vpop.f32.mrf.mxu0 }
 0x191   : > { %1509 = vst.msk [vmem:[%s2490_s20 + $0x40] sm:$0xff] %vm310_vm3, %v1499_v46  ;;  %v1490_v39 = vadd.f32 %v2483_v23, %v1473_v58 }
 0x193   : > { %v1500_v54 = vmax.f32 %v1490_v39, 0.0 }
 0x195   : > { %1510 = vst.msk [vmem:[%s2490_s20 + $0x48] sm:$0xff] %vm310_vm3, %v1500_v54 }
 0x196 PF: > { %s13_s14 = sadd.s32 1, %s2031_s14   ;;  %s2553_s12 = smov %s2027_s13 }
 0x197   : > { %p10_p5 = scmp.ge.s32.totalorder %s13_s14, 4   ;;  %s2554_s13 = smov %s2556_s15 }
 0x199   :  { %12 = sbr.rel (!%p10_p5) target bundleno = 2 (0x2), region = 76 }

// kernel: encoder_block_forward.4
= control target key start
LH: loop header
LB: loop body
LE: loop exit
PB: predicated region body
PF: predicated region fallthrough
CT: control target
= control target key end

     0   :  { %s2116_s12 = smov 0   ;;  %s2118_s13 = smov 0   ;;  %s2610_s0 = inlined_call_operand.vmem [shape: bf16[2,110,4], index: 0, kind: input, shape index: {}]   ;;  %s2611_s1 = inlined_call_operand.vmem [shape: bf16[9,4,8], index: 1, kind: input, shape index: {}]   ;;  %s2612_s2 = inlined_call_operand.vmem [shape: f32[1,8], index: 2, kind: input, shape index: {}]   ;;  %s2613_s3 = inlined_call_operand.vmem [shape: bf16[2,80,8], index: 3, kind: output, shape index: {}]  }
   0x1   :  { %s2120_s14 = smov 0  }
   0x2 LB: > { %s25_s15 = sadd.s32 1, %s2088_s13  ;;  %p1663_p0 = scmp.ge.s32.totalorder %s2092_s14, 1  ;;  %s2092_s14 = sphi %s2120_s14, %s13_s14   ;;  %s2088_s13 = sphi %s2118_s13, %s2615_s13   ;;  %s2084_s12 = sphi %s2116_s12, %s2614_s12  }
   0x3   : > { %p27_p1 = scmp.ge.s32.totalorder %s25_s15, 2  ;;  %p168_p2 = scmp.lt.s32.totalorder %s2092_s14, 3 }
   0x5   : > { %s2617_s15 = smov (%p27_p1, %s25_s15), 0  ;;  %p169_p3 = pnand %p1663_p0, %p168_p2 }
   0x6   : > { %p202_p4 = scmp.lt.s32.totalorder (!%p169_p3), %s2084_s12, 1 }
   0x7   : > { %172 = sbr.rel (%p169_p3) target bundleno = 408 (0x198), region = 32 }
   0xc   : > { %v1666_v0 = vld [vmem:[%s2611_s1 + $0x2] sm:$0x3]  ;;  %vm326_vm0 = vcmask 1041408   ;;  %v2094_v1 = vmov 0.0   ;;  %s2619_s12 = smov (!%p202_p4, %s2084_s12), 1  ;;  %vm2095_vm1 = vmmov 0  }
   0xd   : > { %1819 = vmatprep.subr.bf16.mxu0 %v2094_v1  ;;  %2017 = vmatprep.subr.bf16.mxu1 %v2094_v1  ;;  %v328_v2 = vsel %vm326_vm0, %v1666_v0, 0  ;;  %s2019_s18 = smul.u32 56, %s2619_s12  ;;  %vm265_vm2 = vsmask.f32 7424  ;;  %v1683_v13 = vld [vmem:[%s2611_s1 + $0x4] sm:$0x3] }
   0xe   : > { %1820 = vmatpush3.bf16.msra.mxu0 %v328_v2  ;;  %2018 = vmatpush3.bf16.msra.mxu1 %v328_v2  ;;  %vm310_vm3 = vcmask 31744   ;;  %v233_v22 = vld [vmem:[%s2611_s1] sm:$0x3]  ;;  %v523_v26 = vsel %vm326_vm0, %v1683_v13, 0  ;;  %vm495_vm4 = vcmask 1046528   ;;  %vm928_vm6 = vcmask 1045504  }
   0xf   : > { %1821 = vmatprep.mubr.msk.bf16.mxu0 %vm2095_vm1, %v2094_v1  ;;  %1833 = vmatprep.mubr.msk.bf16.mxu1 %vm2095_vm1, %v2094_v1  ;;  %s2152_s21 = scalar_lea.vmem %s2610_s0, %s2019_s18  ;;  %v414_v31 = vsel %vm326_vm0, %v233_v22, 0  ;;  %v1690_v48 = vld [vmem:[%s2611_s1 + $0x6] sm:$0x3]  ;;  %v1702_v53 = vld [vmem:[%s2611_s1 + $0x8] sm:$0x3]  ;;  %vm1361_vm8 = vcmask 1044480  }
  0x10   : > { %1863 = vmatprep.subr.bf16.mxu0 %v2094_v1  ;;  %1841 = vmatprep.subr.bf16.mxu1 %v2094_v1  ;;  %v223_v3 = vld [vmem:[%s2152_s21] sm:$0xf]  ;;  %v2156_v4 = vld [vmem:[%s2152_s21 + $0x4] sm:$0xf]  ;;  %v2162_v6 = vld [vmem:[%s2152_s21 + $0x8] sm:$0xff]   ;;  %v676_v50 = vsel %vm326_vm0, %v1690_v48, 0 }
  0x11   : > { %v2159_v5 = vcombine.low %v223_v3, %v2156_v4  ;;  %v274_v9 = vshll.u32 %v2162_v6, 16  ;;  %v2168_v10 = vld [vmem:[%s2152_s21 + $0x18] sm:$0xff]   ;;  %v2171_v11 = vld [vmem:[%s2152_s21 + $0x20] sm:$0xff]   ;;  %v2174_v12 = vld [vmem:[%s2152_s21 + $0x10] sm:$0xff]   ;;  %v278_v23 = vshrl.u32 %v2162_v6, 16  ;;  %v497_v52 = vrot.slane %v2162_v6, 1 }
  0x12   : > { %v290_v16 = vshll.u32 %v2168_v10, 16  ;;  %v294_v17 = vshrl.u32 %v2168_v10, 16  ;;  %v298_v18 = vshll.u32 %v2171_v11, 16  ;;  %v2183_v19 = vld [vmem:[%s2152_s21 + $0x28] ss:$0 sps:$4 sm:$0x11]  }
  0x13   : > { %v267_v7 = vshrl.u32 %v2159_v5, 16  ;;  %v269_v8 = vshll.u32 %v2159_v5, 16  ;;  %v276_v15 = vrot.slane %v274_v9, 1  ;;  %v282_v24 = vshll.u32 %v2174_v12, 16  ;;  %v2207_v39 = vld [vmem:[%s2152_s21 + $0x24] sm:$0xff]   ;;  %v2278_v2 = vld [vmem:[%s2152_s21 + $0xc] sm:$0xff]  }
  0x14   : > { %v292_v21 = vrot.slane %v290_v16, 1  ;;  %v300_v25 = vrot.slane %v298_v18, 1  ;;  %v302_v29 = vshrl.u32 %v2171_v11, 16  ;;  %v306_v30 = vshll.u32 %v2183_v19, 16  ;;  %v489_v43 = vld [vmem:[%s2152_s21] sm:$0xe] }
  0x15   : > { %v271_v14 = vrot.slane %v269_v8, 1  ;;  %v280_v33 = vor.u32 %v278_v23, %v276_v15  ;;  %v284_v34 = vrot.slane %v282_v24, 1  ;;  %v286_v38 = vshrl.u32 %v2174_v12, 16  ;;  %v2059_v40 = vld [vmem:[%s2152_s21 + $0x2c] ss:$0 sps:$4 sm:$0x11]  }
  0x16   : > { %v296_v28 = vor.u32 %v294_v17, %v292_v21  ;;  %v304_v35 = vor.u32 %v302_v29, %v300_v25  ;;  %v308_v36 = vrot.slane %v306_v30, 1  ;;  %v656_v44 = vrot.slane %v2207_v39, 1  ;;  %v608_v61 = vld [vmem:[%s2152_s21 + $0x4] sm:$0xe]  ;;  %v2273_v62 = vld [vmem:[%s2152_s21 + $0x8] sm:$0xf] }
  0x17   : > { %v272_v20 = vor.u32 %v271_v14, %v267_v7  ;;  %v285_v37 = vsel %vm265_vm2, %v280_v33, %v284_v34  ;;  %v288_v42 = vor.u32 %v286_v38, %v284_v34  ;;  %v658_v45 = vrot.slane %v2059_v40, 1  ;;  %v2297_v18 = vld [vmem:[%s2152_s21 + $0x14] sm:$0xff]   ;;  %v1716_v24 = vld [vmem:[%s2611_s1 + $0xc] sm:$0x3]  ;;  %v2317_v30 = vld [vmem:[%s2152_s21 + $0x1c] sm:$0xff]   ;;  %s2020_s17 = smul.u32 40, %s2619_s12 }
  0x18   : > { %v301_v32 = vsel %vm265_vm2, %v296_v28, %v300_v25  ;;  %v309_v41 = vsel %vm265_vm2, %v304_v35, %v308_v36  ;;  %v1684_v49 = vcombine.low %v489_v43, %v2156_v4  ;;  %v837_v55 = vsel %vm326_vm0, %v1702_v53, 0  ;;  %v2341_v48 = vld [vmem:[%s2152_s21 + $0x2c] ss:$0 sps:$4 sm:$0x33]   ;;  %v922_v53 = vld [vmem:[%s2152_s21 + $0x4] sm:$0xc] }
  0x19   : > { %v277_v27 = vsel %vm265_vm2, %v272_v20, %v276_v15  ;;  %1834 = vmatmul.mubr.msk.bf16.vlgmr.msra.gmra.mxu1 %vm310_vm3, %v301_v32  ;;  %v2222_v46 = vsel %vm495_vm4, %v656_v44, %v658_v45  ;;  %v293_v47 = vsel %vm265_vm2, %v288_v42, %v292_v21  ;;  %v499_v56 = vrot.slane %v2174_v12, 1  ;;  %s2551_s20 = scalar_lea.vmem %s2613_s3, %s2020_s17 }
  0x1a   : > { %1822 = vmatmul.mubr.msk.bf16.vlgmr.msra.gmra.mxu0 %vm310_vm3, %v277_v27  ;;  %1842 = vmatpush3.bf16.msra.mxu1 %v414_v31  ;;  %v496_v51 = vrot.slane %v1684_v49, 1  ;;  %v501_v58 = vrot.slane %v2168_v10, 1  ;;  %v503_v60 = vrot.slane %v2171_v11, 1  ;;  %v1691_v0 = vcombine.low %v608_v61, %v2273_v62 }
  0x1b   : > { %1864 = vmatpush3.bf16.msra.mxu0 %v523_v26  ;;  %1825 = vmatprep.mubr.msk.bf16.mxu0 %vm2095_vm1, %v2094_v1  ;;  %v500_v57 = vsel %vm495_vm4, %v497_v52, %v499_v56  ;;  %v505_v3 = vrot.slane %v2183_v19, 1  ;;  %v780_v7 = vshll.u32 %v2278_v2, 16  ;;  %v650_v9 = vrot.slane %v2278_v2, 1 }
  0x1c   : > { %1907 = vmatprep.subr.bf16.mxu0 %v2094_v1  ;;  %1837 = vmatprep.mubr.msk.bf16.mxu1 %vm2095_vm1, %v2094_v1  ;;  %v498_v54 = vsel %vm495_vm4, %v496_v51, %v497_v52  ;;  %v502_v59 = vsel %vm495_vm4, %v499_v56, %v501_v58  ;;  %v504_v63 = vsel %vm495_vm4, %v501_v58, %v503_v60  ;;  %v769_v4 = vshrl.u32 %v1691_v0, 16  ;;  %v1041_v58 = vld [vmem:[%s2152_s21 + $0x8] sm:$0xc] }
  0x1d   : > { %1885 = vmatprep.subr.bf16.mxu1 %v2094_v1  ;;  %v649_v8 = vrot.slane %v1691_v0, 1  ;;  %v782_v16 = vrot.slane %v780_v7, 2  ;;  %v786_v21 = vshrl.u32 %v2297_v18, 16  ;;  %v789_v22 = vshll.u32 %v2297_v18, 16  ;;  %v1735_v7 = vld [vmem:[%s2611_s1 + $0x10] sm:$0x3] }
  0x1e   : > { %v771_v13 = vrot.slane %v769_v4, 1  ;;  %vm767_vm5 = vsmask.f32 6400  ;;  %v652_v23 = vrot.slane %v2297_v18, 1  ;;  %v1109_v28 = vsel %vm326_vm0, %v1716_v24, 0 }
  0x1f   : > { %v651_v17 = vsel %vm495_vm4, %v649_v8, %v650_v9  ;;  %v788_v26 = vrot.slane %v786_v21, 1  ;;  %v791_v27 = vrot.slane %v789_v22, 2  ;;  %v795_v32 = vshrl.u32 %v2317_v30, 16 }
  0x20   : > { %v653_v29 = vsel %vm495_vm4, %v650_v9, %v652_v23  ;;  %v798_v33 = vshll.u32 %v2317_v30, 16  ;;  %v654_v34 = vrot.slane %v2317_v30, 1  ;;  %v807_v42 = vshll.u32 %v2207_v39, 16  ;;  %v2392_v9 = vld [vmem:[%s2152_s21 + $0x18] sm:$0xff]  }
  0x21   : > { %1838 = vmatmul.mubr.msk.bf16.gmra.mxu1 %vm310_vm3, %v309_v41  ;;  %v792_v31 = vor.u32 %v791_v27, %v788_v26  ;;  %v797_v36 = vrot.slane %v795_v32, 1  ;;  %v804_v41 = vshrl.u32 %v2207_v39, 16  ;;  %v813_v51 = vshrl.u32 %v2341_v48, 16 }
  0x22   : > { %1826 = vmatmul.mubr.msk.bf16.gmra.mxu0 %vm310_vm3, %v285_v37  ;;  %1843 = vmatprep.mubr.msk.bf16.mxu1 %vm2095_vm1, %v2094_v1  ;;  %v800_v37 = vrot.slane %v798_v33, 2  ;;  %v655_v38 = vsel %vm495_vm4, %v652_v23, %v654_v34  ;;  %v657_v49 = vsel %vm495_vm4, %v654_v34, %v656_v44  ;;  %v816_v52 = vshll.u32 %v2341_v48, 16 }
  0x23   : > { %1829 = vmatprep.mubr.msk.bf16.mxu0 %vm2095_vm1, %v2094_v1  ;;  %v806_v45 = vrot.slane %v804_v41, 1  ;;  %v1710_v56 = vcombine.low %v922_v53, %v2273_v62  ;;  %v930_v61 = vrot.slane %v2278_v2, 2  ;;  %v938_v23 = vrot.slane %v2341_v48, 2 }
  0x24   : > { %v801_v40 = vor.u32 %v800_v37, %v797_v36  ;;  %vm1200_vm7 = vsmask.f32 5376  ;;  %vm1541_vm9 = vcmask 60416  }
  0x26   : > { %v802_v43 = vsel %vm767_vm5, %v792_v31, %v801_v40 }
  0x29   : > { %1844 = vmatmul.mubr.msk.bf16.vlgmr.msra.gmra.mxu1 %vm310_vm3, %v2159_v5  ;;  %v772_v5 = vshll.u32 %v1691_v0, 16 }
  0x2a   : > { %1830 = vmatmul.mubr.msk.bf16.gmra.mxu0 %vm310_vm3, %v293_v47  ;;  %1886 = vmatpush3.bf16.msra.mxu1 %v676_v50  ;;  %v809_v47 = vrot.slane %v807_v42, 2 }
  0x2b   : > { %1865 = vmatprep.mubr.msk.bf16.mxu0 %vm2095_vm1, %v2094_v1  ;;  %1847 = vmatprep.mubr.msk.bf16.mxu1 %vm2095_vm1, %v2094_v1  ;;  %v774_v14 = vrot.slane %v772_v5, 2 }
  0x2c   : > { %1929 = vmatprep.subr.bf16.mxu1 %v2094_v1  ;;  %v810_v50 = vor.u32 %v809_v47, %v806_v45 }
  0x2d   : > { %v775_v19 = vor.u32 %v774_v14, %v771_v13  ;;  %v1085_v13 = vrot.slane %v2392_v9, 2  ;;  %v934_v14 = vrot.slane %v2317_v30, 2 }
  0x2e   : > { %v811_v44 = vsel %vm767_vm5, %v801_v40, %v810_v50  ;;  %v1222_v40 = vshll.u32 %v2392_v9, 16 }
  0x30   : > { %v1224_v47 = vrot.slane %v1222_v40, 3 }
  0x31   : > { %1848 = vmatmul.mubr.msk.bf16.gmra.mxu1 %vm310_vm3, %v2162_v6  ;;  %v777_v6 = vshrl.u32 %v2278_v2, 16 }
  0x32   : > { %1866 = vmatmul.mubr.msk.bf16.vlgmr.msra.gmra.mxu0 %vm310_vm3, %v498_v54  ;;  %1851 = vmatprep.mubr.msk.bf16.mxu1 %vm2095_vm1, %v2094_v1  ;;  %v815_v54 = vrot.slane %v813_v51, 1 }
  0x33   : > { %1908 = vmatpush3.bf16.msra.mxu0 %v837_v55  ;;  %1869 = vmatprep.mubr.msk.bf16.mxu0 %vm2095_vm1, %v2094_v1  ;;  %v779_v15 = vrot.slane %v777_v6, 1  ;;  %v818_v55 = vrot.slane %v816_v52, 2  ;;  %v932_v6 = vrot.slane %v2297_v18, 2 }
  0x34   : > { %1951 = vmatprep.subr.bf16.mxu0 %v2094_v1 }
  0x35   : > { %v783_v20 = vor.u32 %v782_v16, %v779_v15  ;;  %v2406_v16 = vld [vmem:[%s2152_s21 + $0x20] sm:$0xff]  }
  0x36   : > { %v1087_v18 = vrot.slane %v2406_v16, 2  ;;  %v1228_v51 = vshrl.u32 %v2406_v16, 16  ;;  %v1231_v52 = vshll.u32 %v2406_v16, 16 }
  0x37   : > { %v784_v25 = vsel %vm767_vm5, %v775_v19, %v783_v20  ;;  %v793_v35 = vsel %vm767_vm5, %v783_v20, %v792_v31  ;;  %v2419_v20 = vld [vmem:[%s2152_s21 + $0x28] sm:$0xff]  }
  0x38   : > { %v1088_v19 = vsel %vm928_vm6, %v1085_v13, %v1087_v18  ;;  %v1089_v22 = vrot.slane %v2419_v20, 2 }
  0x39   : > { %1852 = vmatmul.mubr.msk.bf16.gmra.mxu1 %vm310_vm3, %v2174_v12  ;;  %v1709_v12 = vld [vmem:[%s2611_s1 + $0xa] sm:$0x3] }
  0x3a   : > { %1870 = vmatmul.mubr.msk.bf16.gmra.mxu0 %vm310_vm3, %v500_v57  ;;  %1855 = vmatprep.mubr.msk.bf16.mxu1 %vm2095_vm1, %v2094_v1  ;;  %v819_v57 = vor.u32 %v818_v55, %v815_v54  ;;  %v1090_v27 = vsel %vm928_vm6, %v1087_v18, %v1089_v22  ;;  %v1230_v54 = vrot.slane %v1228_v51, 2  ;;  %v1233_v55 = vrot.slane %v1231_v52, 3 }
  0x3b   : > { %1873 = vmatprep.mubr.msk.bf16.mxu0 %vm2095_vm1, %v2094_v1 }
  0x3c   : > { %v820_v62 = vsel %vm767_vm5, %v810_v50, %v819_v57  ;;  %v1234_v57 = vor.u32 %v1233_v55, %v1230_v54 }
  0x41   : > { %1856 = vmatmul.mubr.msk.bf16.gmra.mxu1 %vm310_vm3, %v2168_v10  ;;  %v506_v10 = vsel %vm495_vm4, %v503_v60, %v505_v3  ;;  %v929_v60 = vrot.slane %v1710_v56, 2  ;;  %v1365_v56 = vrot.slane %v2392_v9, 3 }
  0x42   : > { %1874 = vmatmul.mubr.msk.bf16.gmra.mxu0 %vm310_vm3, %v502_v59  ;;  %1859 = vmatprep.mubr.msk.bf16.mxu1 %vm2095_vm1, %v2094_v1  ;;  %v2364_v59 = vld [vmem:[%s2152_s21 + $0xc] sm:$0xf] }
  0x43   : > { %1877 = vmatprep.mubr.msk.bf16.mxu0 %vm2095_vm1, %v2094_v1  ;;  %v1717_v0 = vcombine.low %v1041_v58, %v2364_v59  ;;  %v931_v3 = vsel %vm928_vm6, %v929_v60, %v930_v61  ;;  %v1237_v58 = vshrl.u32 %v2419_v20, 16 }
  0x45   : > { %v1082_v2 = vrot.slane %v1717_v0, 2  ;;  %v1205_v24 = vshll.u32 %v1717_v0, 16 }
  0x47   : > { %v1207_v31 = vrot.slane %v1205_v24, 3 }
  0x49   : > { %1860 = vmatmul.mubr.msk.bf16.gmra.mxu1 %vm310_vm3, %v2171_v11  ;;  %v956_v11 = vsel %vm326_vm0, %v1709_v12, 0  ;;  %v933_v12 = vsel %vm928_vm6, %v930_v61, %v932_v6 }
  0x4a   : > { %1878 = vmatmul.mubr.msk.bf16.gmra.mxu0 %vm310_vm3, %v504_v63  ;;  %1887 = vmatprep.mubr.msk.bf16.mxu1 %vm2095_vm1, %v2094_v1  ;;  %v1728_v63 = vld [vmem:[%s2611_s1 + $0xe] sm:$0x3] }
  0x4b   : > { %1881 = vmatprep.mubr.msk.bf16.mxu0 %vm2095_vm1, %v2094_v1  ;;  %v1270_v4 = vsel %vm326_vm0, %v1728_v63, 0 }
  0x51   : > { %1888 = vmatmul.mubr.msk.bf16.vlgmr.msra.gmra.mxu1 %vm310_vm3, %v651_v17  ;;  %v935_v17 = vsel %vm928_vm6, %v932_v6, %v934_v14 }
  0x52   : > { %1882 = vmatmul.mubr.msk.bf16.gmra.mxu0 %vm310_vm3, %v506_v10  ;;  %1930 = vmatpush3.bf16.msra.mxu1 %v956_v11  ;;  %v1389_v10 = vsel %vm326_vm0, %v1735_v7, 0  ;;  %v936_v11 = vrot.slane %v2207_v39, 2  ;;  %v1202_v39 = vshrl.u32 %v1717_v0, 16  ;;  %v2069_v0 = vld [vmem:[%s2152_s21 + $0x30] ss:$0 sps:$4 sm:$0x77]  }
  0x53   : > { %1909 = vmatprep.mubr.msk.bf16.mxu0 %vm2095_vm1, %v2094_v1  ;;  %1891 = vmatprep.mubr.msk.bf16.mxu1 %vm2095_vm1, %v2094_v1 }
  0x54   : > { %1973 = vmatprep.subr.bf16.mxu1 %v2094_v1  ;;  %v937_v21 = vsel %vm928_vm6, %v934_v14, %v936_v11  ;;  %v1204_v30 = vrot.slane %v1202_v39, 2  ;;  %v1371_v14 = vrot.slane %v2069_v0, 3 }
  0x56   : > { %v1208_v36 = vor.u32 %v1207_v31, %v1204_v30 }
  0x59   : > { %1892 = vmatmul.mubr.msk.bf16.gmra.mxu1 %vm310_vm3, %v653_v29  ;;  %v939_v29 = vsel %vm928_vm6, %v936_v11, %v938_v23 }
  0x5a   : > { %1910 = vmatmul.mubr.msk.bf16.vlgmr.msra.gmra.mxu0 %vm310_vm3, %v784_v25  ;;  %1895 = vmatprep.mubr.msk.bf16.mxu1 %vm2095_vm1, %v2094_v1 }
  0x5b   : > { %1952 = vmatpush3.bf16.msra.mxu0 %v1109_v28  ;;  %1913 = vmatprep.mubr.msk.bf16.mxu0 %vm2095_vm1, %v2094_v1  ;;  %v2067_v28 = vld [vmem:[%s2152_s21 + $0x30] ss:$0 sps:$4 sm:$0x33]  }
  0x5c   : > { %1995 = vmatprep.subr.bf16.mxu0 %v2094_v1  ;;  %v1091_v34 = vrot.slane %v2067_v28, 2 }
  0x5e   : > { %v1092_v41 = vsel %vm928_vm6, %v1089_v22, %v1091_v34 }
  0x61   : > { %1896 = vmatmul.mubr.msk.bf16.gmra.mxu1 %vm310_vm3, %v655_v38  ;;  %v1219_v38 = vshrl.u32 %v2392_v9, 16  ;;  %v1369_v9 = vrot.slane %v2419_v20, 3 }
  0x62   : > { %1914 = vmatmul.mubr.msk.bf16.gmra.mxu0 %vm310_vm3, %v793_v35  ;;  %1899 = vmatprep.mubr.msk.bf16.mxu1 %vm2095_vm1, %v2094_v1  ;;  %v1355_v35 = vld [vmem:[%s2152_s21 + $0x8] sm:$0x8] }
  0x63   : > { %1917 = vmatprep.mubr.msk.bf16.mxu0 %vm2095_vm1, %v2094_v1  ;;  %v1736_v42 = vcombine.low %v1355_v35, %v2364_v59  ;;  %v1221_v45 = vrot.slane %v1219_v38, 2  ;;  %v1240_v59 = vshll.u32 %v2419_v20, 16 }
  0x65   : > { %v1362_v48 = vrot.slane %v1736_v42, 3  ;;  %v1225_v50 = vor.u32 %v1224_v47, %v1221_v45  ;;  %v1242_v63 = vrot.slane %v1240_v59, 3 }
  0x67   : > { %v1235_v61 = vsel %vm1200_vm7, %v1225_v50, %v1234_v57 }
  0x69   : > { %1900 = vmatmul.mubr.msk.bf16.gmra.mxu1 %vm310_vm3, %v657_v49 }
  0x6a   : > { %1918 = vmatmul.mubr.msk.bf16.gmra.mxu0 %vm310_vm3, %v802_v43  ;;  %1903 = vmatprep.mubr.msk.bf16.mxu1 %vm2095_vm1, %v2094_v1 }
  0x6b   : > { %1921 = vmatprep.mubr.msk.bf16.mxu0 %vm2095_vm1, %v2094_v1 }
  0x71   : > { %1904 = vmatmul.mubr.msk.bf16.gmra.mxu1 %vm310_vm3, %v2222_v46  ;;  %v2375_v46 = vld [vmem:[%s2152_s21 + $0x10] sm:$0xff]  }
  0x72   : > { %1922 = vmatmul.mubr.msk.bf16.gmra.mxu0 %vm310_vm3, %v811_v44  ;;  %1931 = vmatprep.mubr.msk.bf16.mxu1 %vm2095_vm1, %v2094_v1  ;;  %v1083_v5 = vrot.slane %v2375_v46, 2  ;;  %v1210_v25 = vshrl.u32 %v2375_v46, 16  ;;  %v1213_v26 = vshll.u32 %v2375_v46, 16  ;;  %v1363_v49 = vrot.slane %v2375_v46, 3 }
  0x73   : > { %1925 = vmatprep.mubr.msk.bf16.mxu0 %vm2095_vm1, %v2094_v1  ;;  %v1367_v46 = vrot.slane %v2406_v16, 3 }
  0x74   : > { %v1084_v8 = vsel %vm928_vm6, %v1082_v2, %v1083_v5  ;;  %v1086_v15 = vsel %vm928_vm6, %v1083_v5, %v1085_v13  ;;  %v1212_v32 = vrot.slane %v1210_v25, 2  ;;  %v1215_v33 = vrot.slane %v1213_v26, 3 }
  0x75   : > { %v1364_v53 = vsel %vm1361_vm8, %v1362_v48, %v1363_v49  ;;  %v1366_v60 = vsel %vm1361_vm8, %v1363_v49, %v1365_v56  ;;  %v1249_v2 = vshll.u32 %v2069_v0, 16  ;;  %v1368_v5 = vsel %vm1361_vm8, %v1365_v56, %v1367_v46 }
  0x76   : > { %v1216_v37 = vor.u32 %v1215_v33, %v1212_v32 }
  0x78   : > { %v1217_v43 = vsel %vm1200_vm7, %v1208_v36, %v1216_v37  ;;  %v1226_v44 = vsel %vm1200_vm7, %v1216_v37, %v1225_v50 }
  0x79   : > { %1932 = vmatmul.mubr.msk.bf16.vlgmr.msra.gmra.mxu1 %vm310_vm3, %v931_v3 }
  0x7a   : > { %1926 = vmatmul.mubr.msk.bf16.gmra.mxu0 %vm310_vm3, %v820_v62  ;;  %1974 = vmatpush3.bf16.msra.mxu1 %v1270_v4  ;;  %v1239_v62 = vrot.slane %v1237_v58, 2  ;;  %v1246_v4 = vshrl.u32 %v2069_v0, 16 }
  0x7b   : > { %1953 = vmatprep.mubr.msk.bf16.mxu0 %vm2095_vm1, %v2094_v1  ;;  %1935 = vmatprep.mubr.msk.bf16.mxu1 %vm2095_vm1, %v2094_v1 }
  0x7c   : > { %v1243_v3 = vor.u32 %v1242_v63, %v1239_v62  ;;  %v1248_v7 = vrot.slane %v1246_v4, 2 }
  0x7e   : > { %v1244_v6 = vsel %vm1200_vm7, %v1234_v57, %v1243_v3 }
  0x81   : > { %1936 = vmatmul.mubr.msk.bf16.gmra.mxu1 %vm310_vm3, %v933_v12  ;;  %v1370_v12 = vsel %vm1361_vm8, %v1367_v46, %v1369_v9 }
  0x82   : > { %1954 = vmatmul.mubr.msk.bf16.vlgmr.msra.gmra.mxu0 %vm310_vm3, %v1084_v8  ;;  %1939 = vmatprep.mubr.msk.bf16.mxu1 %vm2095_vm1, %v2094_v1  ;;  %v1251_v8 = vrot.slane %v1249_v2, 3 }
  0x83   : > { %1996 = vmatpush3.bf16.msra.mxu0 %v1389_v10  ;;  %1957 = vmatprep.mubr.msk.bf16.mxu0 %vm2095_vm1, %v2094_v1 }
  0x84   : > { %v1252_v10 = vor.u32 %v1251_v8, %v1248_v7 }
  0x86   : > { %v1253_v13 = vsel %vm1200_vm7, %v1243_v3, %v1252_v10 }
  0x89   : > { %1940 = vmatmul.mubr.msk.bf16.gmra.mxu1 %vm310_vm3, %v935_v17 }
  0x8a   : > { %1958 = vmatmul.mubr.msk.bf16.gmra.mxu0 %vm310_vm3, %v1086_v15  ;;  %1943 = vmatprep.mubr.msk.bf16.mxu1 %vm2095_vm1, %v2094_v1  ;;  %v1372_v15 = vsel %vm1361_vm8, %v1369_v9, %v1371_v14 }
  0x8b   : > { %1961 = vmatprep.mubr.msk.bf16.mxu0 %vm2095_vm1, %v2094_v1 }
  0x91   : > { %1944 = vmatmul.mubr.msk.bf16.gmra.mxu1 %vm310_vm3, %v937_v21 }
  0x92   : > { %1962 = vmatmul.mubr.msk.bf16.gmra.mxu0 %vm310_vm3, %v1088_v19  ;;  %1947 = vmatprep.mubr.msk.bf16.mxu1 %vm2095_vm1, %v2094_v1 }
  0x93   : > { %1965 = vmatprep.mubr.msk.bf16.mxu0 %vm2095_vm1, %v2094_v1 }
  0x99   : > { %1948 = vmatmul.mubr.msk.bf16.gmra.mxu1 %vm310_vm3, %v939_v29 }
  0x9a   : > { %1966 = vmatmul.mubr.msk.bf16.gmra.mxu0 %vm310_vm3, %v1090_v27  ;;  %1975 = vmatprep.mubr.msk.bf16.mxu1 %vm2095_vm1, %v2094_v1 }
  0x9b   : > { %1969 = vmatprep.mubr.msk.bf16.mxu0 %vm2095_vm1, %v2094_v1 }
  0xa1   : > { %1976 = vmatmul.mubr.msk.bf16.vlgmr.msra.gmra.mxu1 %vm310_vm3, %v1217_v43 }
  0xa2   : > { %1970 = vmatmul.mubr.msk.bf16.gmra.mxu0 %vm310_vm3, %v1092_v41  ;;  %1979 = vmatprep.mubr.msk.bf16.mxu1 %vm2095_vm1, %v2094_v1 }
  0xa3   : > { %1997 = vmatprep.mubr.msk.bf16.mxu0 %vm2095_vm1, %v2094_v1 }
  0xa9   : > { %1980 = vmatmul.mubr.msk.bf16.gmra.mxu1 %vm310_vm3, %v1226_v44 }
  0xaa   : > { %1998 = vmatmul.mubr.msk.bf16.vlgmr.msra.gmra.mxu0 %vm310_vm3, %v1364_v53  ;;  %1983 = vmatprep.mubr.msk.bf16.mxu1 %vm2095_vm1, %v2094_v1 }
  0xab   : > { %2001 = vmatprep.mubr.msk.bf16.mxu0 %vm2095_vm1, %v2094_v1 }
  0xb1   : > { %1984 = vmatmul.mubr.msk.bf16.gmra.mxu1 %vm310_vm3, %v1235_v61 }
  0xb2   : > { %2002 = vmatmul.mubr.msk.bf16.gmra.mxu0 %vm310_vm3, %v1366_v60  ;;  %1987 = vmatprep.mubr.msk.bf16.mxu1 %vm2095_vm1, %v2094_v1 }
  0xb3   : > { %2005 = vmatprep.mubr.msk.bf16.mxu0 %vm2095_vm1, %v2094_v1 }
  0xb9   : > { %1988 = vmatmul.mubr.msk.bf16.gmra.mxu1 %vm310_vm3, %v1244_v6 }
  0xba   : > { %2006 = vmatmul.mubr.msk.bf16.gmra.mxu0 %vm310_vm3, %v1368_v5  ;;  %1991 = vmatprep.mubr.msk.bf16.mxu1 %vm2095_vm1, %v2094_v1 }
  0xbb   : > { %2009 = vmatprep.mubr.msk.bf16.mxu0 %vm2095_vm1, %v2094_v1 }
  0xc1   : > { %1992 = vmatmul.mubr.msk.bf16.gmra.mxu1 %vm310_vm3, %v1253_v13 }
  0xc2   : > { %2010 = vmatmul.mubr.msk.bf16.gmra.mxu0 %vm310_vm3, %v1370_v12 }
  0xc3   : > { %2013 = vmatprep.mubr.msk.bf16.mxu0 %vm2095_vm1, %v2094_v1 }
  0xca   : > { %2014 = vmatmul.mubr.msk.bf16.gmra.mxu0 %vm310_vm3, %v1372_v15 }
  0xd9   : > { %v388_v17 = vpop.f32.mrf.mxu1 }
  0xda   : > { %v364_v16 = vpop.f32.mrf.mxu0 }
  0xdb   : > { %v1835_v11 = vpop.f32.mrf.mxu1 }
  0xdc   : > { %v1823_v18 = vpop.f32.mrf.mxu0 }
  0xdd   : > { %v391_v20 = vpop.f32.mrf.mxu1 }
  0xde   : > { %v367_v19 = vpop.f32.mrf.mxu0 }
  0xdf   : > { %v1836_v22 = vpop.f32.mrf.mxu1 }
  0xe0   : > { %v1824_v21 = vpop.f32.mrf.mxu0 }
  0xe1   : > { %v396_v39 = vpop.f32.mrf.mxu1 }
  0xe2   : > { %v372_v23 = vpop.f32.mrf.mxu0 }
  0xe3   : > { %v1839_v25 = vpop.f32.mrf.mxu1 }
  0xe4   : > { %v1827_v24 = vpop.f32.mrf.mxu0 }
  0xe5   : > { %v399_v26 = vpop.f32.mrf.mxu1 }
  0xe6   : > { %v375_v1 = vpop.f32.mrf.mxu0 }
  0xe7   : > { %v1840_v28 = vpop.f32.mrf.mxu1 }
  0xe8   : > { %v1828_v27 = vpop.f32.mrf.mxu0 }
  0xe9   : > { %v450_v30 = vpop.f32.mrf.mxu1 }
  0xea   : > { %v380_v29 = vpop.f32.mrf.mxu0  ;;  %v451_v32 = vadd.f32 %v450_v30, %v364_v16 }
  0xeb   : > { %v1845_v33 = vpop.f32.mrf.mxu1 }
  0xec   : > { %v1831_v31 = vpop.f32.mrf.mxu0 }
  0xed   : > { %v453_v35 = vpop.f32.mrf.mxu1 }
  0xee   : > { %v383_v34 = vpop.f32.mrf.mxu0  ;;  %v454_v37 = vadd.f32 %v453_v35, %v367_v19 }
  0xef   : > { %v1846_v38 = vpop.f32.mrf.mxu1 }
  0xf0   : > { %v1832_v36 = vpop.f32.mrf.mxu0 }
  0xf1   : > { %v458_v42 = vpop.f32.mrf.mxu1 }
  0xf2   : > { %v559_v40 = vpop.f32.mrf.mxu0  ;;  %v459_v45 = vadd.f32 %v458_v42, %v372_v23 }
  0xf3   : > { %v598_v41 = vadd.f32 %v559_v40, %v451_v32  ;;  %v1849_v47 = vpop.f32.mrf.mxu1 }
  0xf4   : > { %v1867_v43 = vpop.f32.mrf.mxu0 }
  0xf5   : > { %v461_v50 = vpop.f32.mrf.mxu1 }
  0xf6   : > { %v562_v48 = vpop.f32.mrf.mxu0  ;;  %v462_v52 = vadd.f32 %v461_v50, %v375_v1 }
  0xf7   : > { %v599_v49 = vadd.f32 %v562_v48, %v454_v37  ;;  %v1850_v53 = vpop.f32.mrf.mxu1 }
  0xf8   : > { %v1868_v51 = vpop.f32.mrf.mxu0 }
  0xf9   : > { %v466_v55 = vpop.f32.mrf.mxu1 }
  0xfa   : > { %v567_v44 = vpop.f32.mrf.mxu0  ;;  %v467_v57 = vadd.f32 %v466_v55, %v380_v29 }
  0xfb   : > { %v600_v54 = vadd.f32 %v567_v44, %v459_v45  ;;  %v1853_v58 = vpop.f32.mrf.mxu1 }
  0xfc   : > { %v1871_v56 = vpop.f32.mrf.mxu0 }
  0xfd   : > { %v469_v61 = vpop.f32.mrf.mxu1 }
  0xfe   : > { %v570_v59 = vpop.f32.mrf.mxu0  ;;  %v470_v63 = vadd.f32 %v469_v61, %v383_v34 }
  0xff   : > { %v601_v60 = vadd.f32 %v570_v59, %v462_v52  ;;  %v1854_v0 = vpop.f32.mrf.mxu1 }
 0x100   : > { %v1872_v62 = vpop.f32.mrf.mxu0 }
 0x101   : > { %v474_v4 = vpop.f32.mrf.mxu1 }
 0x102   : > { %v575_v46 = vpop.f32.mrf.mxu0  ;;  %v475_v5 = vadd.f32 %v474_v4, %v388_v17 }
 0x103   : > { %v602_v3 = vadd.f32 %v575_v46, %v467_v57  ;;  %v1857_v6 = vpop.f32.mrf.mxu1 }
 0x104   : > { %v1875_v2 = vpop.f32.mrf.mxu0 }
 0x105   : > { %v477_v9 = vpop.f32.mrf.mxu1 }
 0x106   : > { %v578_v7 = vpop.f32.mrf.mxu0  ;;  %v478_v12 = vadd.f32 %v477_v9, %v391_v20 }
 0x107   : > { %v603_v8 = vadd.f32 %v578_v7, %v470_v63  ;;  %v1858_v13 = vpop.f32.mrf.mxu1 }
 0x108   : > { %v1876_v10 = vpop.f32.mrf.mxu0 }
 0x109   : > { %v482_v16 = vpop.f32.mrf.mxu1 }
 0x10a   : > { %v583_v14 = vpop.f32.mrf.mxu0  ;;  %v483_v11 = vadd.f32 %v482_v16, %v396_v39 }
 0x10b   : > { %v604_v15 = vadd.f32 %v583_v14, %v475_v5  ;;  %v1861_v19 = vpop.f32.mrf.mxu1 }
 0x10c   : > { %v1879_v18 = vpop.f32.mrf.mxu0 }
 0x10d   : > { %v485_v23 = vpop.f32.mrf.mxu1 }
 0x10e   : > { %v586_v21 = vpop.f32.mrf.mxu0  ;;  %v486_v25 = vadd.f32 %v485_v23, %v399_v26 }
 0x10f   : > { %v605_v22 = vadd.f32 %v586_v21, %v478_v12  ;;  %v1862_v1 = vpop.f32.mrf.mxu1 }
 0x110   : > { %v1880_v24 = vpop.f32.mrf.mxu0 }
 0x111   : > { %v712_v28 = vpop.f32.mrf.mxu1 }
 0x112   : > { %v591_v17 = vpop.f32.mrf.mxu0  ;;  %v751_v30 = vadd.f32 %v712_v28, %v598_v41 }
 0x113   : > { %v606_v27 = vadd.f32 %v591_v17, %v483_v11  ;;  %v1889_v31 = vpop.f32.mrf.mxu1 }
 0x114   : > { %v1883_v29 = vpop.f32.mrf.mxu0 }
 0x115   : > { %v715_v33 = vpop.f32.mrf.mxu1 }
 0x116   : > { %v594_v20 = vpop.f32.mrf.mxu0  ;;  %v752_v35 = vadd.f32 %v715_v33, %v599_v49 }
 0x117   : > { %v607_v32 = vadd.f32 %v594_v20, %v486_v25  ;;  %v1890_v36 = vpop.f32.mrf.mxu1 }
 0x118   : > { %v1884_v34 = vpop.f32.mrf.mxu0 }
 0x119   : > { %v720_v38 = vpop.f32.mrf.mxu1 }
 0x11a   : > { %v873_v39 = vpop.f32.mrf.mxu0  ;;  %v753_v42 = vadd.f32 %v720_v38, %v600_v54 }
 0x11b   : > { %v2494_v37 = vadd.f32 %v873_v39, %v751_v30  ;;  %v1893_v26 = vpop.f32.mrf.mxu1 }
 0x11c   : > { %v1911_v40 = vpop.f32.mrf.mxu0 }
 0x11d   : > { %v723_v47 = vpop.f32.mrf.mxu1 }
 0x11e   : > { %v876_v43 = vpop.f32.mrf.mxu0  ;;  %v754_v41 = vadd.f32 %v723_v47, %v601_v60 }
 0x11f   : > { %v2496_v45 = vadd.f32 %v876_v43, %v752_v35  ;;  %v1894_v50 = vpop.f32.mrf.mxu1 }
 0x120   : > { %v1912_v48 = vpop.f32.mrf.mxu0 }
 0x121   : > { %v728_v53 = vpop.f32.mrf.mxu1 }
 0x122   : > { %v881_v51 = vpop.f32.mrf.mxu0  ;;  %v755_v44 = vadd.f32 %v728_v53, %v602_v3 }
 0x123   : > { %v2498_v52 = vadd.f32 %v881_v51, %v753_v42  ;;  %v1897_v55 = vpop.f32.mrf.mxu1 }
 0x124   : > { %v1915_v49 = vpop.f32.mrf.mxu0 }
 0x125   : > { %v731_v58 = vpop.f32.mrf.mxu1 }
 0x126   : > { %v884_v56 = vpop.f32.mrf.mxu0  ;;  %v756_v59 = vadd.f32 %v731_v58, %v603_v8 }
 0x127   : > { %v2500_v57 = vadd.f32 %v884_v56, %v754_v41  ;;  %v1898_v61 = vpop.f32.mrf.mxu1 }
 0x128   : > { %v1916_v54 = vpop.f32.mrf.mxu0 }
 0x129   : > { %v736_v0 = vpop.f32.mrf.mxu1 }
 0x12a   : > { %v889_v62 = vpop.f32.mrf.mxu0  ;;  %v757_v46 = vadd.f32 %v736_v0, %v604_v15 }
 0x12b   : > { %v2502_v63 = vadd.f32 %v889_v62, %v755_v44  ;;  %v1901_v4 = vpop.f32.mrf.mxu1 }
 0x12c   : > { %v1919_v60 = vpop.f32.mrf.mxu0 }
 0x12d   : > { %v739_v6 = vpop.f32.mrf.mxu1 }
 0x12e   : > { %v892_v2 = vpop.f32.mrf.mxu0  ;;  %v758_v7 = vadd.f32 %v739_v6, %v605_v22 }
 0x12f   : > { %v2504_v5 = vadd.f32 %v892_v2, %v756_v59  ;;  %v1902_v9 = vpop.f32.mrf.mxu1 }
 0x130   : > { %v1920_v3 = vpop.f32.mrf.mxu0 }
 0x131   : > { %v744_v13 = vpop.f32.mrf.mxu1 }
 0x132   : > { %v897_v10 = vpop.f32.mrf.mxu0  ;;  %v759_v14 = vadd.f32 %v744_v13, %v606_v27 }
 0x133   : > { %v2506_v12 = vadd.f32 %v897_v10, %v757_v46  ;;  %v1905_v16 = vpop.f32.mrf.mxu1 }
 0x134   : > { %v1923_v8 = vpop.f32.mrf.mxu0 }
 0x135   : > { %v747_v19 = vpop.f32.mrf.mxu1 }
 0x136   : > { %v900_v18 = vpop.f32.mrf.mxu0  ;;  %v760_v21 = vadd.f32 %v747_v19, %v607_v32 }
 0x137   : > { %v2508_v11 = vadd.f32 %v900_v18, %v758_v7  ;;  %v1906_v23 = vpop.f32.mrf.mxu1 }
 0x138   : > { %v1924_v15 = vpop.f32.mrf.mxu0  ;;  %v2543_v23 = vld [vmem:[%s2612_s2] ss:$0 sm:$0xff] }
 0x139   : > { %v992_v1 = vpop.f32.mrf.mxu1 }
 0x13a   : > { %v905_v24 = vpop.f32.mrf.mxu0  ;;  %v1031_v9 = vadd.f32 %v992_v1, %v2494_v37 }
 0x13b   : > { %v2510_v25 = vadd.f32 %v905_v24, %v759_v14  ;;  %v1933_v17 = vpop.f32.mrf.mxu1 }
 0x13c   : > { %v1927_v22 = vpop.f32.mrf.mxu0 }
 0x13d   : > { %v995_v30 = vpop.f32.mrf.mxu1 }
 0x13e   : > { %v908_v28 = vpop.f32.mrf.mxu0  ;;  %v1032_v18 = vadd.f32 %v995_v30, %v2496_v45 }
 0x13f   : > { %v2512_v29 = vadd.f32 %v908_v28, %v760_v21  ;;  %v1934_v27 = vpop.f32.mrf.mxu1 }
 0x140   : > { %v1928_v31 = vpop.f32.mrf.mxu0 }
 0x141   : > { %v1000_v33 = vpop.f32.mrf.mxu1 }
 0x142   : > { %v1145_v20 = vpop.f32.mrf.mxu0  ;;  %v1033_v1 = vadd.f32 %v1000_v33, %v2498_v52 }
 0x143   : > { %v1937_v35 = vpop.f32.mrf.mxu1  ;;  %v1184_v8 = vadd.f32 %v1145_v20, %v1031_v9 }
 0x144   : > { %v1955_v34 = vpop.f32.mrf.mxu0 }
 0x145   : > { %v1003_v39 = vpop.f32.mrf.mxu1 }
 0x146   : > { %v1148_v36 = vpop.f32.mrf.mxu0 }
 0x147   : > { %v1938_v38 = vpop.f32.mrf.mxu1  ;;  %v1185_v24 = vadd.f32 %v1148_v36, %v1032_v18 }
 0x148   : > { %v1956_v32 = vpop.f32.mrf.mxu0 }
 0x149   : > { %v2514_v42 = vpop.f32.mrf.mxu1  ;;  %v1034_v32 = vadd.f32 %v1003_v39, %v2500_v57 }
 0x14a   : > { %v1153_v40 = vpop.f32.mrf.mxu0 }
 0x14b   : > { %v1941_v43 = vpop.f32.mrf.mxu1  ;;  %v1186_v30 = vadd.f32 %v1153_v40, %v1033_v1 }
 0x14c   : > { %v1959_v26 = vpop.f32.mrf.mxu0 }
 0x14d   : > { %v2516_v48 = vpop.f32.mrf.mxu1 }
 0x14e   : > { %v1156_v47 = vpop.f32.mrf.mxu0  ;;  %v1036_v9 = vadd.f32 %v2516_v48, %v2504_v5 }
 0x14f   : > { %v1942_v50 = vpop.f32.mrf.mxu1  ;;  %v1187_v43 = vadd.f32 %v1156_v47, %v1034_v32 }
 0x150   : > { %v1960_v41 = vpop.f32.mrf.mxu0 }
 0x151   : > { %v2520_v53 = vpop.f32.mrf.mxu1 }
 0x152   : > { %v2518_v51 = vpop.f32.mrf.mxu0 }
 0x153   : > { %v1945_v44 = vpop.f32.mrf.mxu1 }
 0x154   : > { %v1963_v49 = vpop.f32.mrf.mxu0 }
 0x155   : > { %v2524_v56 = vpop.f32.mrf.mxu1 }
 0x156   : > { %v2522_v55 = vpop.f32.mrf.mxu0 }
 0x157   : > { %v1946_v54 = vpop.f32.mrf.mxu1 }
 0x158   : > { %v1964_v58 = vpop.f32.mrf.mxu0 }
 0x159   : > { %v2528_v61 = vpop.f32.mrf.mxu1  ;;  %v1035_v58 = vadd.f32 %v2514_v42, %v2502_v63 }
 0x15a   : > { %v2526_v59 = vpop.f32.mrf.mxu0 }
 0x15b   : > { %v1949_v0 = vpop.f32.mrf.mxu1 }
 0x15c   : > { %v1967_v62 = vpop.f32.mrf.mxu0 }
 0x15d   : > { %v2532_v46 = vpop.f32.mrf.mxu1 }
 0x15e   : > { %v2530_v60 = vpop.f32.mrf.mxu0 }
 0x15f   : > { %v1950_v2 = vpop.f32.mrf.mxu1 }
 0x160   : > { %v1968_v4 = vpop.f32.mrf.mxu0 }
 0x161   : > { %v1306_v3 = vpop.f32.mrf.mxu1  ;;  %v1188_v4 = vadd.f32 %v2518_v51, %v1035_v58 }
 0x162   : > { %v2534_v6 = vpop.f32.mrf.mxu0  ;;  %v1345_v19 = vadd.f32 %v1306_v3, %v1184_v8 }
 0x163   : > { %v1977_v10 = vpop.f32.mrf.mxu1 }
 0x164   : > { %v1971_v7 = vpop.f32.mrf.mxu0 }
 0x165   : > { %v1309_v14 = vpop.f32.mrf.mxu1 }
 0x166   : > { %v2537_v13 = vpop.f32.mrf.mxu0  ;;  %v1346_v28 = vadd.f32 %v1309_v14, %v1185_v24 }
 0x167   : > { %v1978_v15 = vpop.f32.mrf.mxu1 }
 0x168   : > { %v1972_v16 = vpop.f32.mrf.mxu0 }
 0x169   : > { %v1314_v17 = vpop.f32.mrf.mxu1  ;;  %v1189_v16 = vadd.f32 %v2522_v55, %v1036_v9 }
 0x16a   : > { %v1425_v21 = vpop.f32.mrf.mxu0  ;;  %v1347_v52 = vadd.f32 %v1314_v17, %v1186_v30 }
 0x16b   : > { %v1464_v22 = vadd.f32 %v1425_v21, %v1345_v19  ;;  %v1981_v27 = vpop.f32.mrf.mxu1  ;;  %v1037_v21 = vadd.f32 %v2520_v53, %v2506_v12 }
 0x16c   : > { %v1999_v37 = vpop.f32.mrf.mxu0  ;;  %v1038_v27 = vadd.f32 %v2524_v56, %v2508_v11 }
 0x16d   : > { %v1481_v31 = vadd.f32 %v2543_v23, %v1464_v22  ;;  %v1317_v35 = vpop.f32.mrf.mxu1  ;;  %v1190_v37 = vadd.f32 %v2526_v59, %v1037_v21 }
 0x16e   : > { %v1428_v45 = vpop.f32.mrf.mxu0  ;;  %v1348_v54 = vadd.f32 %v1317_v35, %v1187_v43 }
 0x16f   : > { %v1491_v20 = vmax.f32 %v1481_v31, 0.0  ;;  %v1465_v34 = vadd.f32 %v1428_v45, %v1346_v28  ;;  %v1982_v26 = vpop.f32.mrf.mxu1 }
 0x170   : > { %v2000_v36 = vpop.f32.mrf.mxu0 }
 0x171   : > { %v1755_v33 = vpack.c.bf16 %v1491_v20, %v1491_v20  ;;  %v1482_v38 = vadd.f32 %v2543_v23, %v1465_v34  ;;  %v1322_v49 = vpop.f32.mrf.mxu1  ;;  %v1191_v34 = vadd.f32 %v2530_v60, %v1038_v27 }
 0x172   : > { %v1433_v40 = vpop.f32.mrf.mxu0  ;;  %v1349_v10 = vadd.f32 %v1322_v49, %v1188_v4  ;;  %v1040_v49 = vadd.f32 %v2532_v46, %v2512_v29 }
 0x173   : > { %1542 = vst.msk [vmem:[%s2551_s20] sm:$0xf] %vm1541_vm9, %v1755_v33  ;;  %v1492_v41 = vmax.f32 %v1482_v38, 0.0  ;;  %v1466_v50 = vadd.f32 %v1433_v40, %v1347_v52  ;;  %v1985_v39 = vpop.f32.mrf.mxu1  ;;  %v1039_v52 = vadd.f32 %v2528_v61, %v2510_v25 }
 0x174   : > { %v2003_v44 = vpop.f32.mrf.mxu0 }
 0x175   : > { %v1756_v62 = vpack.c.bf16 %v1492_v41, %v1492_v41  ;;  %v1483_v57 = vadd.f32 %v2543_v23, %v1466_v50  ;;  %v1325_v3 = vpop.f32.mrf.mxu1  ;;  %v1192_v40 = vadd.f32 %v2534_v6, %v1039_v52 }
 0x176   : > { %v1436_v0 = vpop.f32.mrf.mxu0  ;;  %v1350_v24 = vadd.f32 %v1325_v3, %v1189_v16 }
 0x177   : > { %1543 = vst.msk [vmem:[%s2551_s20 + $0x4] sm:$0xf] %vm1541_vm9, %v1756_v62  ;;  %v1493_v47 = vmax.f32 %v1483_v57, 0.0  ;;  %v1467_v2 = vadd.f32 %v1436_v0, %v1348_v54  ;;  %v1986_v8 = vpop.f32.mrf.mxu1  ;;  %v1193_v62 = vadd.f32 %v2537_v13, %v1040_v49 }
 0x178   : > { %v2004_v7 = vpop.f32.mrf.mxu0 }
 0x179   : > { %v1757_v63 = vpack.c.bf16 %v1493_v47, %v1493_v47  ;;  %v1484_v42 = vadd.f32 %v2543_v23, %v1467_v2  ;;  %v1330_v19 = vpop.f32.mrf.mxu1 }
 0x17a   : > { %v1441_v14 = vpop.f32.mrf.mxu0  ;;  %v1351_v45 = vadd.f32 %v1330_v19, %v1190_v37 }
 0x17b   : > { %1544 = vst.msk [vmem:[%s2551_s20 + $0x8] sm:$0xf] %vm1541_vm9, %v1757_v63  ;;  %v1494_v51 = vmax.f32 %v1484_v42, 0.0  ;;  %v1468_v18 = vadd.f32 %v1441_v14, %v1349_v10  ;;  %v1989_v22 = vpop.f32.mrf.mxu1 }
 0x17c   : > { %v2007_v15 = vpop.f32.mrf.mxu0 }
 0x17d   : > { %v1758_v5 = vpack.c.bf16 %v1494_v51, %v1494_v51  ;;  %v1485_v48 = vadd.f32 %v2543_v23, %v1468_v18  ;;  %v1333_v28 = vpop.f32.mrf.mxu1 }
 0x17e   : > { %v1444_v17 = vpop.f32.mrf.mxu0  ;;  %v1352_v33 = vadd.f32 %v1333_v28, %v1191_v34 }
 0x17f   : > { %1545 = vst.msk [vmem:[%s2551_s20 + $0xc] sm:$0xf] %vm1541_vm9, %v1758_v5  ;;  %v1495_v55 = vmax.f32 %v1485_v48, 0.0  ;;  %v1469_v1 = vadd.f32 %v1444_v17, %v1350_v24  ;;  %v1990_v30 = vpop.f32.mrf.mxu1 }
 0x180   : > { %v2008_v31 = vpop.f32.mrf.mxu0 }
 0x181   : > { %v1759_v12 = vpack.c.bf16 %v1495_v55, %v1495_v55  ;;  %v1486_v53 = vadd.f32 %v2543_v23, %v1469_v1  ;;  %v1338_v36 = vpop.f32.mrf.mxu1 }
 0x182   : > { %v1449_v20 = vpop.f32.mrf.mxu0  ;;  %v1353_v25 = vadd.f32 %v1338_v36, %v1192_v40 }
 0x183   : > { %1546 = vst.msk [vmem:[%s2551_s20 + $0x10] sm:$0xf] %vm1541_vm9, %v1759_v12  ;;  %v1496_v59 = vmax.f32 %v1486_v53, 0.0  ;;  %v1470_v35 = vadd.f32 %v1449_v20, %v1351_v45  ;;  %v1993_v38 = vpop.f32.mrf.mxu1 }
 0x184   : > { %v2011_v32 = vpop.f32.mrf.mxu0 }
 0x185   : > { %v1760_v11 = vpack.c.bf16 %v1496_v59, %v1496_v59  ;;  %v1487_v56 = vadd.f32 %v2543_v23, %v1470_v35  ;;  %v1341_v41 = vpop.f32.mrf.mxu1 }
 0x186   : > { %v1452_v26 = vpop.f32.mrf.mxu0  ;;  %v1354_v0 = vadd.f32 %v1341_v41, %v1193_v62 }
 0x187   : > { %1547 = vst.msk [vmem:[%s2551_s20 + $0x14] sm:$0xf] %vm1541_vm9, %v1760_v11  ;;  %v1497_v60 = vmax.f32 %v1487_v56, 0.0  ;;  %v1471_v43 = vadd.f32 %v1452_v26, %v1352_v33  ;;  %v1994_v58 = vpop.f32.mrf.mxu1 }
 0x188   : > { %v2012_v50 = vpop.f32.mrf.mxu0 }
 0x189   : > { %v1761_v61 = vpack.c.bf16 %v1497_v60, %v1497_v60  ;;  %v1488_v44 = vadd.f32 %v2543_v23, %v1471_v43 }
 0x18a   : > { %v1457_v54 = vpop.f32.mrf.mxu0 }
 0x18b   : > { %1548 = vst.msk [vmem:[%s2551_s20 + $0x18] sm:$0xf] %vm1541_vm9, %v1761_v61  ;;  %v1498_v6 = vmax.f32 %v1488_v44, 0.0  ;;  %v1472_v57 = vadd.f32 %v1457_v54, %v1353_v25 }
 0x18c   : > { %v2015_v39 = vpop.f32.mrf.mxu0 }
 0x18d   : > { %v1762_v4 = vpack.c.bf16 %v1498_v6, %v1498_v6  ;;  %v1489_v47 = vadd.f32 %v2543_v23, %v1472_v57 }
 0x18e   : > { %v1460_v29 = vpop.f32.mrf.mxu0 }
 0x18f   : > { %1549 = vst.msk [vmem:[%s2551_s20 + $0x1c] sm:$0xf] %vm1541_vm9, %v1762_v4  ;;  %v1499_v46 = vmax.f32 %v1489_v47, 0.0  ;;  %v1473_v2 = vadd.f32 %v1460_v29, %v1354_v0 }
 0x190   : > { %v2016_v3 = vpop.f32.mrf.mxu0 }
 0x191   : > { %v1763_v7 = vpack.c.bf16 %v1499_v46, %v1499_v46  ;;  %v1490_v9 = vadd.f32 %v2543_v23, %v1473_v2 }
 0x193   : > { %1550 = vst.msk [vmem:[%s2551_s20 + $0x20] sm:$0xf] %vm1541_vm9, %v1763_v7  ;;  %v1500_v13 = vmax.f32 %v1490_v9, 0.0 }
 0x195   : > { %v1764_v10 = vpack.c.bf16 %v1500_v13, %v1500_v13 }
 0x197   : > { %1551 = vst.msk [vmem:[%s2551_s20 + $0x24] sm:$0xf] %vm1541_vm9, %v1764_v10 }
 0x198 PF: > { %s13_s14 = sadd.s32 1, %s2092_s14   ;;  %s2614_s12 = smov %s2088_s13 }
 0x199   : > { %p10_p5 = scmp.ge.s32.totalorder %s13_s14, 4   ;;  %s2615_s13 = smov %s2617_s15 }
 0x19b   :  { %12 = sbr.rel (!%p10_p5) target bundleno = 2 (0x2), region = 76 }

</bundles_post_ra>
